<compile_context>
chip_gen: v6e
topology: v6e:2x2x1
jax: 0.10.0
libtpu: 0.0.40
codegen_flags: <defaults>
</compile_context>

<pallas_src>
import jax
import jax.numpy as jnp
from jax import lax
from jax.experimental import pallas as pl
from jax.experimental.pallas import tpu as pltpu  # noqa: F401  (kept for TPU-specific tuning hooks)

# ---- small, consistent config ----
B = 2                      # batch
L = 8                      # sequence length of x
D = 32                     # qkv_dim == embed dim
H = 4                      # num_heads
HD = D // H                # head_dim
MLP_DIM = 128              # config.mlp_dim
NUM_LAYERS = 2             # config.num_layers (ONE TransformerBlock reused -> shared weights)
S = L + 1                  # conditioner(temb) token + sequence
BS = B * S                 # flattened rows
LN_EPS = 1e-5
ATTN_SCALE = 1.0 / (HD ** 0.5)
NEG_INF = -1e30
TRANSFORMER_NORM_TYPE = "prenorm"   # config.transformer_norm_type


def _layernorm(x):
    # fresh nn.LayerNorm(...)(x) inside the torch forward: weight=1, bias=0, eps=1e-5
    mu = jnp.mean(x, axis=-1, keepdims=True)
    xc = x - mu
    var = jnp.mean(xc * xc, axis=-1, keepdims=True)
    return xc * lax.rsqrt(var + LN_EPS)


def _mha(x2, wqkv, bqkv, wo, bo, batch_mask):
    """Multi-head self-attention on a flattened (B*S, D) activation.

    Fused lane-dense QKV projection (one matmul), per-head logits/context with a
    block-diagonal batch mask (so batch stays a sublane-major dim and needs no
    slicing), lane concat of head contexts, single out-projection matmul.
    """
    qkv = jnp.dot(x2.astype(jnp.bfloat16), wqkv,
                  preferred_element_type=jnp.float32) + bqkv        # (BS, 3D) f32

    ctx_heads = []
    for h in range(H):                                              # intrinsic per-head step only
        qh = qkv[:, h * HD:(h + 1) * HD].astype(jnp.bfloat16)       # (BS, HD)
        kh = qkv[:, D + h * HD:D + (h + 1) * HD].astype(jnp.bfloat16)
        vh = qkv[:, 2 * D + h * HD:2 * D + (h + 1) * HD].astype(jnp.bfloat16)
        lg = jnp.einsum('qe,ke->qk', qh, kh,
                        preferred_element_type=jnp.float32) * ATTN_SCALE   # (BS, BS) f32
        lg = jnp.where(batch_mask, lg, NEG_INF)                     # no cross-batch attention
        m = jnp.max(lg, axis=-1, keepdims=True)
        e = jnp.exp(lg - m)
        p = e * pl.reciprocal(jnp.sum(e, axis=-1, keepdims=True), approx=True)
        ctx_heads.append(jnp.dot(p.astype(jnp.bfloat16), vh,
                                 preferred_element_type=jnp.float32))      # (BS, HD)

    ctx = jnp.concatenate(ctx_heads, axis=-1)                       # (BS, D), lane concat
    return jnp.dot(ctx.astype(jnp.bfloat16), wo,
                   preferred_element_type=jnp.float32) + bo


def _mlp(x2, w1, w2):
    """TransformerMlpBlock (intended semantics): Dense -> ReLU -> Dense, no bias."""
    h1 = jnp.dot(x2.astype(jnp.bfloat16), w1, preferred_element_type=jnp.float32)
    h1 = jnp.maximum(h1, 0.0)
    return jnp.dot(h1.astype(jnp.bfloat16), w2, preferred_element_type=jnp.float32)


def transformer_encoder_kernel(
    x_ref,      # (BS, D)   [temb | x] flattened
    pos_ref,    # (BS, D)   pos_embed replicated over batch (layout plumbing)
    wqkv_ref,   # (D, 3D)   [wq | wk | wv]
    bqkv_ref,   # (1, 3D)   [bq | bk | bv]
    wo_ref,     # (D, D)
    bo_ref,     # (1, D)
    w1_ref,     # (D, MLP_DIM)
    w2_ref,     # (MLP_DIM, D)
    out_ref,    # (BS, D)
):
    # pos-embed add; encoder-level dropout is identity (eval / deterministic)
    x = x_ref[...] + pos_ref[...]

    # hoist loop-invariant weight loads + one-time bf16 operand casts
    wqkv = wqkv_ref[...].astype(jnp.bfloat16)
    bqkv = bqkv_ref[...]
    wo = wo_ref[...].astype(jnp.bfloat16)
    bo = bo_ref[...]
    w1 = w1_ref[...].astype(jnp.bfloat16)
    w2 = w2_ref[...].astype(jnp.bfloat16)

    # block-diagonal batch mask (hoisted): row i and col j may attend iff they
    # belong to the same batch element.  Built from 2-D iotas + compares only.
    rows = lax.broadcasted_iota(jnp.int32, (BS, BS), 0)
    cols = lax.broadcasted_iota(jnp.int32, (BS, BS), 1)
    blocks = []
    for b in range(B):
        r_in = (rows >= b * S) & (rows < (b + 1) * S)
        c_in = (cols >= b * S) & (cols < (b + 1) * S)
        blocks.append(r_in & c_in)
    batch_mask = blocks[0]
    for mb in blocks[1:]:
        batch_mask = batch_mask | mb

    # static unroll; the torch module reuses ONE block (shared weights) per layer
    for _ in range(NUM_LAYERS):
        inputs = x
        if TRANSFORMER_NORM_TYPE == "prenorm":
            a = _mha(_layernorm(inputs), wqkv, bqkv, wo, bo, batch_mask)
            x = a + inputs                                   # dropout = identity
            z = _mlp(_layernorm(x), w1, w2)
            x = x + z
        else:                                                # 'postnorm'
            a = _mha(inputs, wqkv, bqkv, wo, bo, batch_mask)
            x = _layernorm(a + inputs)
            z = _mlp(x, w1, w2)
            x = _layernorm(x + z)

    out_ref[...] = x


def init_params(key):
    """Deterministic synthetic parameters (canonical x @ W + b layouts).
    In-projection biases are non-zero so the fused-QKV bias layout is exercised."""
    keys = jax.random.split(key, 11)

    def xavier(k, fan_in, fan_out):
        s = (6.0 / (fan_in + fan_out)) ** 0.5
        return jax.random.uniform(k, (fan_in, fan_out), jnp.float32, -s, s)

    p = {}
    p["wq"] = xavier(keys[0], D, D)
    p["wk"] = xavier(keys[1], D, D)
    p["wv"] = xavier(keys[2], D, D)
    p["bq"] = jax.random.uniform(keys[3], (D,), jnp.float32, -0.1, 0.1)
    p["bk"] = jax.random.uniform(keys[4], (D,), jnp.float32, -0.1, 0.1)
    p["bv"] = jax.random.uniform(keys[5], (D,), jnp.float32, -0.1, 0.1)
    p["wo"] = xavier(keys[6], D, D)
    p["bo"] = jax.random.uniform(keys[7], (D,), jnp.float32, -D ** -0.5, D ** -0.5)
    # TransformerMlpBlock (bias=False on both Linears)
    p["w1"] = xavier(keys[8], D, MLP_DIM)
    p["w2"] = xavier(keys[9], MLP_DIM, D)
    # pos_embed: nn.Parameter(torch.empty(1, S, D).uniform_()) created in forward
    p["pos"] = jax.random.uniform(keys[10], (1, S, D), jnp.float32)
    return p


def transformer_encoder(x, temb, params, conditioner=None):
    # ---- wrapper: layout plumbing only (no compute hoisted out of the kernel) ----
    temb3 = temb[:, None, :]
    cond = temb3 if conditioner is None else jnp.concatenate([conditioner, temb3], axis=1)
    x_full = jnp.concatenate([cond, x], axis=1)                       # (B, S, D)
    assert x_full.shape == (B, S, D)
    x2 = x_full.reshape(BS, D)                                        # lane-dense 2-D layout
    pos2 = jnp.broadcast_to(params["pos"], (B, S, D)).reshape(BS, D)  # tiny layout replication

    wqkv = jnp.concatenate([params["wq"], params["wk"], params["wv"]], axis=1)   # (D, 3D)
    bqkv = jnp.concatenate([params["bq"], params["bk"], params["bv"]])[None, :]  # (1, 3D)
    wo = params["wo"]
    bo = params["bo"][None, :]
    w1 = params["w1"]
    w2 = params["w2"]

    # whole problem (<1 MiB) runs as a single VMEM-resident invocation: no grid,
    # no pipeline scaffolding.
    out2 = pl.pallas_call(
        transformer_encoder_kernel,
        out_shape=jax.ShapeDtypeStruct((BS, D), jnp.float32),
    )(x2, pos2, wqkv, bqkv, wo, bo, w1, w2)

    out = out2.reshape(B, S, D)
    # drop the conditioner token (x = x[:, 1:]) -- free slice in the wrapper
    return out[:, 1:, :]


def _reference_forward(x, temb, params):
    """Pure-JAX f32 reference of the same forward (standard head-reshape path)."""
    P = lax.Precision.HIGHEST
    h = jnp.concatenate([temb[:, None, :], x], axis=1) + params["pos"]

    def ln(v):
        mu = v.mean(-1, keepdims=True)
        va = ((v - mu) ** 2).mean(-1, keepdims=True)
        return (v - mu) / jnp.sqrt(va + LN_EPS)

    def mha(v):
        q = jnp.einsum('bsd,de->bse', v, params["wq"], precision=P) + params["bq"]
        k = jnp.einsum('bsd,de->bse', v, params["wk"], precision=P) + params["bk"]
        w = jnp.einsum('bsd,de->bse', v, params["wv"], precision=P) + params["bv"]
        q = q.reshape(B, S, H, HD); k = k.reshape(B, S, H, HD); w = w.reshape(B, S, H, HD)
        lg = jnp.einsum('bqhe,bkhe->bhqk', q, k, precision=P) / (HD ** 0.5)
        p = jax.nn.softmax(lg, axis=-1)
        ctx = jnp.einsum('bhqk,bkhe->bqhe', p, w, precision=P).reshape(B, S, D)
        return jnp.einsum('bsd,de->bse', ctx, params["wo"], precision=P) + params["bo"]

    def mlp(v):
        t = jax.nn.relu(jnp.einsum('bsd,dm->bsm', v, params["w1"], precision=P))
        return jnp.einsum('bsm,md->bsd', t, params["w2"], precision=P)

    for _ in range(NUM_LAYERS):
        if TRANSFORMER_NORM_TYPE == "prenorm":
            h = mha(ln(h)) + h
            h = h + mlp(ln(h))
        else:
            h = ln(mha(h) + h)
            h = ln(h + mlp(h))
    return h[:, 1:]


if __name__ == "__main__":
    key = jax.random.PRNGKey(0)
    kx, kt, kp = jax.random.split(key, 3)
    x = jax.random.normal(kx, (B, L, D), jnp.float32)
    temb = jax.random.normal(kt, (B, D), jnp.float32)
    params = init_params(kp)

    out = jax.block_until_ready(transformer_encoder(x, temb, params))

    assert out.shape == (B, L, D) and out.dtype == jnp.float32
    assert bool(jnp.all(jnp.isfinite(out)))

    ref = _reference_forward(x, temb, params)
    max_err = float(jnp.max(jnp.abs(out - ref)))
    # bf16 MXU operands + approx-reciprocal softmax vs f32 HIGHEST reference
    assert bool(jnp.allclose(out, ref, rtol=5e-2, atol=1e-1)), f"max abs err {max_err}"
    print("KERNEL_OK")
</pallas_src>

<mosaic_0001>
module attributes {stable_mosaic.version = 11 : i64} {
  func.func @transformer_encoder_kernel(%arg0: memref<18x32xf32, #tpu.memory_space<vmem>>, %arg1: memref<18x32xf32, #tpu.memory_space<vmem>>, %arg2: memref<32x96xf32, #tpu.memory_space<vmem>>, %arg3: memref<1x96xf32, #tpu.memory_space<vmem>>, %arg4: memref<32x32xf32, #tpu.memory_space<vmem>>, %arg5: memref<1x32xf32, #tpu.memory_space<vmem>>, %arg6: memref<32x128xf32, #tpu.memory_space<vmem>>, %arg7: memref<128x32xf32, #tpu.memory_space<vmem>>, %arg8: memref<18x32xf32, #tpu.memory_space<vmem>>) attributes {dimension_semantics = [], scalar_prefetch = 0 : i64, scratch_operands = 0 : i64, tpu.core_type = #tpu.core_type<tc>} {
    %c0 = arith.constant 0 : index
    %c0_0 = arith.constant 0 : index
    %0 = vector.load %arg0[%c0, %c0_0] : memref<18x32xf32, #tpu.memory_space<vmem>>, vector<18x32xf32>
    %c0_1 = arith.constant 0 : index
    %c0_2 = arith.constant 0 : index
    %1 = vector.load %arg1[%c0_1, %c0_2] : memref<18x32xf32, #tpu.memory_space<vmem>>, vector<18x32xf32>
    %2 = arith.addf %0, %1 : vector<18x32xf32>
    %c0_3 = arith.constant 0 : index
    %c0_4 = arith.constant 0 : index
    %3 = vector.load %arg2[%c0_3, %c0_4] : memref<32x96xf32, #tpu.memory_space<vmem>>, vector<32x96xf32>
    %4 = arith.truncf %3 : vector<32x96xf32> to vector<32x96xbf16>
    %c0_5 = arith.constant 0 : index
    %c0_6 = arith.constant 0 : index
    %5 = vector.load %arg3[%c0_5, %c0_6] : memref<1x96xf32, #tpu.memory_space<vmem>>, vector<1x96xf32>
    %c0_7 = arith.constant 0 : index
    %c0_8 = arith.constant 0 : index
    %6 = vector.load %arg4[%c0_7, %c0_8] : memref<32x32xf32, #tpu.memory_space<vmem>>, vector<32x32xf32>
    %7 = arith.truncf %6 : vector<32x32xf32> to vector<32x32xbf16>
    %c0_9 = arith.constant 0 : index
    %c0_10 = arith.constant 0 : index
    %8 = vector.load %arg5[%c0_9, %c0_10] : memref<1x32xf32, #tpu.memory_space<vmem>>, vector<1x32xf32>
    %c0_11 = arith.constant 0 : index
    %c0_12 = arith.constant 0 : index
    %9 = vector.load %arg6[%c0_11, %c0_12] : memref<32x128xf32, #tpu.memory_space<vmem>>, vector<32x128xf32>
    %10 = arith.truncf %9 : vector<32x128xf32> to vector<32x128xbf16>
    %c0_13 = arith.constant 0 : index
    %c0_14 = arith.constant 0 : index
    %11 = vector.load %arg7[%c0_13, %c0_14] : memref<128x32xf32, #tpu.memory_space<vmem>>, vector<128x32xf32>
    %12 = arith.truncf %11 : vector<128x32xf32> to vector<128x32xbf16>
    %13 = tpu.iota {dimensions = array<i32: 0>} : vector<18x18xi32>
    %14 = tpu.iota {dimensions = array<i32: 1>} : vector<18x18xi32>
    %c0_i32 = arith.constant 0 : i32
    %15 = vector.broadcast %c0_i32 : i32 to vector<18x18xi32>
    %16 = arith.cmpi sge, %13, %15 : vector<18x18xi32>
    %c9_i32 = arith.constant 9 : i32
    %17 = vector.broadcast %c9_i32 : i32 to vector<18x18xi32>
    %18 = arith.cmpi slt, %13, %17 : vector<18x18xi32>
    %19 = arith.andi %16, %18 : vector<18x18xi1>
    %c0_i32_15 = arith.constant 0 : i32
    %20 = vector.broadcast %c0_i32_15 : i32 to vector<18x18xi32>
    %21 = arith.cmpi sge, %14, %20 : vector<18x18xi32>
    %c9_i32_16 = arith.constant 9 : i32
    %22 = vector.broadcast %c9_i32_16 : i32 to vector<18x18xi32>
    %23 = arith.cmpi slt, %14, %22 : vector<18x18xi32>
    %24 = arith.andi %21, %23 : vector<18x18xi1>
    %25 = arith.andi %19, %24 : vector<18x18xi1>
    %c9_i32_17 = arith.constant 9 : i32
    %26 = vector.broadcast %c9_i32_17 : i32 to vector<18x18xi32>
    %27 = arith.cmpi sge, %13, %26 : vector<18x18xi32>
    %c18_i32 = arith.constant 18 : i32
    %28 = vector.broadcast %c18_i32 : i32 to vector<18x18xi32>
    %29 = arith.cmpi slt, %13, %28 : vector<18x18xi32>
    %30 = arith.andi %27, %29 : vector<18x18xi1>
    %c9_i32_18 = arith.constant 9 : i32
    %31 = vector.broadcast %c9_i32_18 : i32 to vector<18x18xi32>
    %32 = arith.cmpi sge, %14, %31 : vector<18x18xi32>
    %c18_i32_19 = arith.constant 18 : i32
    %33 = vector.broadcast %c18_i32_19 : i32 to vector<18x18xi32>
    %34 = arith.cmpi slt, %14, %33 : vector<18x18xi32>
    %35 = arith.andi %32, %34 : vector<18x18xi1>
    %36 = arith.andi %30, %35 : vector<18x18xi1>
    %37 = arith.ori %25, %36 : vector<18x18xi1>
    %cst = arith.constant dense<0.000000e+00> : vector<18xf32>
    %38 = vector.multi_reduction <add>, %2, %cst [1] : vector<18x32xf32> to vector<18xf32>
    %39 = vector.shape_cast %38 : vector<18xf32> to vector<18x1xf32>
    %cst_20 = arith.constant 3.200000e+01 : f32
    %40 = vector.broadcast %cst_20 : f32 to vector<18x1xf32>
    %41 = arith.divf %39, %40 : vector<18x1xf32>
    %42 = vector.broadcast %41 : vector<18x1xf32> to vector<18x32xf32>
    %43 = arith.subf %2, %42 : vector<18x32xf32>
    %44 = arith.mulf %43, %43 : vector<18x32xf32>
    %cst_21 = arith.constant dense<0.000000e+00> : vector<18xf32>
    %45 = vector.multi_reduction <add>, %44, %cst_21 [1] : vector<18x32xf32> to vector<18xf32>
    %46 = vector.shape_cast %45 : vector<18xf32> to vector<18x1xf32>
    %cst_22 = arith.constant 3.200000e+01 : f32
    %47 = vector.broadcast %cst_22 : f32 to vector<18x1xf32>
    %48 = arith.divf %46, %47 : vector<18x1xf32>
    %cst_23 = arith.constant 9.99999974E-6 : f32
    %49 = vector.broadcast %cst_23 : f32 to vector<18x1xf32>
    %50 = arith.addf %48, %49 : vector<18x1xf32>
    %51 = math.rsqrt %50 : vector<18x1xf32>
    %52 = vector.broadcast %51 : vector<18x1xf32> to vector<18x32xf32>
    %53 = arith.mulf %43, %52 : vector<18x32xf32>
    %54 = arith.truncf %53 : vector<18x32xf32> to vector<18x32xbf16>
    %cst_24 = arith.constant dense<0.000000e+00> : vector<18x96xf32>
    %55 = tpu.matmul %54, %4, %cst_24 {dimension_numbers = #tpu.dot_dimension_numbers<[1], [0], [0], [1], [0, 0, 1, 1], [], []>} : vector<18x32xbf16>, vector<32x96xbf16>, vector<18x96xf32> -> vector<18x96xf32>
    %56 = vector.broadcast %5 : vector<1x96xf32> to vector<18x96xf32>
    %57 = arith.addf %55, %56 : vector<18x96xf32>
    %58 = vector.extract_strided_slice %57 {offsets = [0, 0], sizes = [18, 8], strides = [1, 1]} : vector<18x96xf32> to vector<18x8xf32>
    %59 = arith.truncf %58 : vector<18x8xf32> to vector<18x8xbf16>
    %60 = vector.extract_strided_slice %57 {offsets = [0, 32], sizes = [18, 8], strides = [1, 1]} : vector<18x96xf32> to vector<18x8xf32>
    %61 = arith.truncf %60 : vector<18x8xf32> to vector<18x8xbf16>
    %62 = vector.extract_strided_slice %57 {offsets = [0, 64], sizes = [18, 8], strides = [1, 1]} : vector<18x96xf32> to vector<18x8xf32>
    %63 = arith.truncf %62 : vector<18x8xf32> to vector<18x8xbf16>
    "tpu.trace_start"() <{level = 10 : i32, message = "qe,ke->qk"}> : () -> ()
    %cst_25 = arith.constant dense<0.000000e+00> : vector<18x18xf32>
    %64 = tpu.matmul %59, %61, %cst_25 {dimension_numbers = #tpu.dot_dimension_numbers<[1], [1], [0], [0], [0, 0, 1, 0], [], []>} : vector<18x8xbf16>, vector<18x8xbf16>, vector<18x18xf32> -> vector<18x18xf32>
    "tpu.trace_stop"() : () -> ()
    %cst_26 = arith.constant 0.353553385 : f32
    %65 = vector.broadcast %cst_26 : f32 to vector<18x18xf32>
    %66 = arith.mulf %64, %65 : vector<18x18xf32>
    %cst_27 = arith.constant -1.000000e+30 : f32
    %67 = vector.broadcast %cst_27 : f32 to vector<18x18xf32>
    %68 = arith.select %37, %66, %67 : vector<18x18xi1>, vector<18x18xf32>
    %cst_28 = arith.constant dense<0xFF800000> : vector<18xf32>
    %69 = vector.multi_reduction <maximumf>, %68, %cst_28 [1] : vector<18x18xf32> to vector<18xf32>
    %70 = vector.shape_cast %69 : vector<18xf32> to vector<18x1xf32>
    %71 = vector.broadcast %70 : vector<18x1xf32> to vector<18x18xf32>
    %72 = arith.subf %68, %71 : vector<18x18xf32>
    %73 = math.exp %72 : vector<18x18xf32>
    %cst_29 = arith.constant dense<0.000000e+00> : vector<18xf32>
    %74 = vector.multi_reduction <add>, %73, %cst_29 [1] : vector<18x18xf32> to vector<18xf32>
    %75 = vector.shape_cast %74 : vector<18xf32> to vector<18x1xf32>
    %76 = tpu.reciprocal %75 {approx = true} : vector<18x1xf32> -> vector<18x1xf32>
    %77 = vector.broadcast %76 : vector<18x1xf32> to vector<18x18xf32>
    %78 = arith.mulf %73, %77 : vector<18x18xf32>
    %79 = arith.truncf %78 : vector<18x18xf32> to vector<18x18xbf16>
    %cst_30 = arith.constant dense<0.000000e+00> : vector<18x8xf32>
    %80 = tpu.matmul %79, %63, %cst_30 {dimension_numbers = #tpu.dot_dimension_numbers<[1], [0], [0], [1], [0, 0, 1, 1], [], []>} : vector<18x18xbf16>, vector<18x8xbf16>, vector<18x8xf32> -> vector<18x8xf32>
    %81 = vector.extract_strided_slice %57 {offsets = [0, 8], sizes = [18, 8], strides = [1, 1]} : vector<18x96xf32> to vector<18x8xf32>
    %82 = arith.truncf %81 : vector<18x8xf32> to vector<18x8xbf16>
    %83 = vector.extract_strided_slice %57 {offsets = [0, 40], sizes = [18, 8], strides = [1, 1]} : vector<18x96xf32> to vector<18x8xf32>
    %84 = arith.truncf %83 : vector<18x8xf32> to vector<18x8xbf16>
    %85 = vector.extract_strided_slice %57 {offsets = [0, 72], sizes = [18, 8], strides = [1, 1]} : vector<18x96xf32> to vector<18x8xf32>
    %86 = arith.truncf %85 : vector<18x8xf32> to vector<18x8xbf16>
    "tpu.trace_start"() <{level = 10 : i32, message = "qe,ke->qk"}> : () -> ()
    %cst_31 = arith.constant dense<0.000000e+00> : vector<18x18xf32>
    %87 = tpu.matmul %82, %84, %cst_31 {dimension_numbers = #tpu.dot_dimension_numbers<[1], [1], [0], [0], [0, 0, 1, 0], [], []>} : vector<18x8xbf16>, vector<18x8xbf16>, vector<18x18xf32> -> vector<18x18xf32>
    "tpu.trace_stop"() : () -> ()
    %cst_32 = arith.constant 0.353553385 : f32
    %88 = vector.broadcast %cst_32 : f32 to vector<18x18xf32>
    %89 = arith.mulf %87, %88 : vector<18x18xf32>
    %cst_33 = arith.constant -1.000000e+30 : f32
    %90 = vector.broadcast %cst_33 : f32 to vector<18x18xf32>
    %91 = arith.select %37, %89, %90 : vector<18x18xi1>, vector<18x18xf32>
    %cst_34 = arith.constant dense<0xFF800000> : vector<18xf32>
    %92 = vector.multi_reduction <maximumf>, %91, %cst_34 [1] : vector<18x18xf32> to vector<18xf32>
    %93 = vector.shape_cast %92 : vector<18xf32> to vector<18x1xf32>
    %94 = vector.broadcast %93 : vector<18x1xf32> to vector<18x18xf32>
    %95 = arith.subf %91, %94 : vector<18x18xf32>
    %96 = math.exp %95 : vector<18x18xf32>
    %cst_35 = arith.constant dense<0.000000e+00> : vector<18xf32>
    %97 = vector.multi_reduction <add>, %96, %cst_35 [1] : vector<18x18xf32> to vector<18xf32>
    %98 = vector.shape_cast %97 : vector<18xf32> to vector<18x1xf32>
    %99 = tpu.reciprocal %98 {approx = true} : vector<18x1xf32> -> vector<18x1xf32>
    %100 = vector.broadcast %99 : vector<18x1xf32> to vector<18x18xf32>
    %101 = arith.mulf %96, %100 : vector<18x18xf32>
    %102 = arith.truncf %101 : vector<18x18xf32> to vector<18x18xbf16>
    %cst_36 = arith.constant dense<0.000000e+00> : vector<18x8xf32>
    %103 = tpu.matmul %102, %86, %cst_36 {dimension_numbers = #tpu.dot_dimension_numbers<[1], [0], [0], [1], [0, 0, 1, 1], [], []>} : vector<18x18xbf16>, vector<18x8xbf16>, vector<18x8xf32> -> vector<18x8xf32>
    %104 = vector.extract_strided_slice %57 {offsets = [0, 16], sizes = [18, 8], strides = [1, 1]} : vector<18x96xf32> to vector<18x8xf32>
    %105 = arith.truncf %104 : vector<18x8xf32> to vector<18x8xbf16>
    %106 = vector.extract_strided_slice %57 {offsets = [0, 48], sizes = [18, 8], strides = [1, 1]} : vector<18x96xf32> to vector<18x8xf32>
    %107 = arith.truncf %106 : vector<18x8xf32> to vector<18x8xbf16>
    %108 = vector.extract_strided_slice %57 {offsets = [0, 80], sizes = [18, 8], strides = [1, 1]} : vector<18x96xf32> to vector<18x8xf32>
    %109 = arith.truncf %108 : vector<18x8xf32> to vector<18x8xbf16>
    "tpu.trace_start"() <{level = 10 : i32, message = "qe,ke->qk"}> : () -> ()
    %cst_37 = arith.constant dense<0.000000e+00> : vector<18x18xf32>
    %110 = tpu.matmul %105, %107, %cst_37 {dimension_numbers = #tpu.dot_dimension_numbers<[1], [1], [0], [0], [0, 0, 1, 0], [], []>} : vector<18x8xbf16>, vector<18x8xbf16>, vector<18x18xf32> -> vector<18x18xf32>
    "tpu.trace_stop"() : () -> ()
    %cst_38 = arith.constant 0.353553385 : f32
    %111 = vector.broadcast %cst_38 : f32 to vector<18x18xf32>
    %112 = arith.mulf %110, %111 : vector<18x18xf32>
    %cst_39 = arith.constant -1.000000e+30 : f32
    %113 = vector.broadcast %cst_39 : f32 to vector<18x18xf32>
    %114 = arith.select %37, %112, %113 : vector<18x18xi1>, vector<18x18xf32>
    %cst_40 = arith.constant dense<0xFF800000> : vector<18xf32>
    %115 = vector.multi_reduction <maximumf>, %114, %cst_40 [1] : vector<18x18xf32> to vector<18xf32>
    %116 = vector.shape_cast %115 : vector<18xf32> to vector<18x1xf32>
    %117 = vector.broadcast %116 : vector<18x1xf32> to vector<18x18xf32>
    %118 = arith.subf %114, %117 : vector<18x18xf32>
    %119 = math.exp %118 : vector<18x18xf32>
    %cst_41 = arith.constant dense<0.000000e+00> : vector<18xf32>
    %120 = vector.multi_reduction <add>, %119, %cst_41 [1] : vector<18x18xf32> to vector<18xf32>
    %121 = vector.shape_cast %120 : vector<18xf32> to vector<18x1xf32>
    %122 = tpu.reciprocal %121 {approx = true} : vector<18x1xf32> -> vector<18x1xf32>
    %123 = vector.broadcast %122 : vector<18x1xf32> to vector<18x18xf32>
    %124 = arith.mulf %119, %123 : vector<18x18xf32>
    %125 = arith.truncf %124 : vector<18x18xf32> to vector<18x18xbf16>
    %cst_42 = arith.constant dense<0.000000e+00> : vector<18x8xf32>
    %126 = tpu.matmul %125, %109, %cst_42 {dimension_numbers = #tpu.dot_dimension_numbers<[1], [0], [0], [1], [0, 0, 1, 1], [], []>} : vector<18x18xbf16>, vector<18x8xbf16>, vector<18x8xf32> -> vector<18x8xf32>
    %127 = vector.extract_strided_slice %57 {offsets = [0, 24], sizes = [18, 8], strides = [1, 1]} : vector<18x96xf32> to vector<18x8xf32>
    %128 = arith.truncf %127 : vector<18x8xf32> to vector<18x8xbf16>
    %129 = vector.extract_strided_slice %57 {offsets = [0, 56], sizes = [18, 8], strides = [1, 1]} : vector<18x96xf32> to vector<18x8xf32>
    %130 = arith.truncf %129 : vector<18x8xf32> to vector<18x8xbf16>
    %131 = vector.extract_strided_slice %57 {offsets = [0, 88], sizes = [18, 8], strides = [1, 1]} : vector<18x96xf32> to vector<18x8xf32>
    %132 = arith.truncf %131 : vector<18x8xf32> to vector<18x8xbf16>
    "tpu.trace_start"() <{level = 10 : i32, message = "qe,ke->qk"}> : () -> ()
    %cst_43 = arith.constant dense<0.000000e+00> : vector<18x18xf32>
    %133 = tpu.matmul %128, %130, %cst_43 {dimension_numbers = #tpu.dot_dimension_numbers<[1], [1], [0], [0], [0, 0, 1, 0], [], []>} : vector<18x8xbf16>, vector<18x8xbf16>, vector<18x18xf32> -> vector<18x18xf32>
    "tpu.trace_stop"() : () -> ()
    %cst_44 = arith.constant 0.353553385 : f32
    %134 = vector.broadcast %cst_44 : f32 to vector<18x18xf32>
    %135 = arith.mulf %133, %134 : vector<18x18xf32>
    %cst_45 = arith.constant -1.000000e+30 : f32
    %136 = vector.broadcast %cst_45 : f32 to vector<18x18xf32>
    %137 = arith.select %37, %135, %136 : vector<18x18xi1>, vector<18x18xf32>
    %cst_46 = arith.constant dense<0xFF800000> : vector<18xf32>
    %138 = vector.multi_reduction <maximumf>, %137, %cst_46 [1] : vector<18x18xf32> to vector<18xf32>
    %139 = vector.shape_cast %138 : vector<18xf32> to vector<18x1xf32>
    %140 = vector.broadcast %139 : vector<18x1xf32> to vector<18x18xf32>
    %141 = arith.subf %137, %140 : vector<18x18xf32>
    %142 = math.exp %141 : vector<18x18xf32>
    %cst_47 = arith.constant dense<0.000000e+00> : vector<18xf32>
    %143 = vector.multi_reduction <add>, %142, %cst_47 [1] : vector<18x18xf32> to vector<18xf32>
    %144 = vector.shape_cast %143 : vector<18xf32> to vector<18x1xf32>
    %145 = tpu.reciprocal %144 {approx = true} : vector<18x1xf32> -> vector<18x1xf32>
    %146 = vector.broadcast %145 : vector<18x1xf32> to vector<18x18xf32>
    %147 = arith.mulf %142, %146 : vector<18x18xf32>
    %148 = arith.truncf %147 : vector<18x18xf32> to vector<18x18xbf16>
    %cst_48 = arith.constant dense<0.000000e+00> : vector<18x8xf32>
    %149 = tpu.matmul %148, %132, %cst_48 {dimension_numbers = #tpu.dot_dimension_numbers<[1], [0], [0], [1], [0, 0, 1, 1], [], []>} : vector<18x18xbf16>, vector<18x8xbf16>, vector<18x8xf32> -> vector<18x8xf32>
    %150 = tpu.concatenate %80, %103, %126, %149 in 1 : vector<18x8xf32>, vector<18x8xf32>, vector<18x8xf32>, vector<18x8xf32> -> vector<18x32xf32>
    %151 = arith.truncf %150 : vector<18x32xf32> to vector<18x32xbf16>
    %cst_49 = arith.constant dense<0.000000e+00> : vector<18x32xf32>
    %152 = tpu.matmul %151, %7, %cst_49 {dimension_numbers = #tpu.dot_dimension_numbers<[1], [0], [0], [1], [0, 0, 1, 1], [], []>} : vector<18x32xbf16>, vector<32x32xbf16>, vector<18x32xf32> -> vector<18x32xf32>
    %153 = vector.broadcast %8 : vector<1x32xf32> to vector<18x32xf32>
    %154 = arith.addf %152, %153 : vector<18x32xf32>
    %155 = arith.addf %154, %2 : vector<18x32xf32>
    %cst_50 = arith.constant dense<0.000000e+00> : vector<18xf32>
    %156 = vector.multi_reduction <add>, %155, %cst_50 [1] : vector<18x32xf32> to vector<18xf32>
    %157 = vector.shape_cast %156 : vector<18xf32> to vector<18x1xf32>
    %cst_51 = arith.constant 3.200000e+01 : f32
    %158 = vector.broadcast %cst_51 : f32 to vector<18x1xf32>
    %159 = arith.divf %157, %158 : vector<18x1xf32>
    %160 = vector.broadcast %159 : vector<18x1xf32> to vector<18x32xf32>
    %161 = arith.subf %155, %160 : vector<18x32xf32>
    %162 = arith.mulf %161, %161 : vector<18x32xf32>
    %cst_52 = arith.constant dense<0.000000e+00> : vector<18xf32>
    %163 = vector.multi_reduction <add>, %162, %cst_52 [1] : vector<18x32xf32> to vector<18xf32>
    %164 = vector.shape_cast %163 : vector<18xf32> to vector<18x1xf32>
    %cst_53 = arith.constant 3.200000e+01 : f32
    %165 = vector.broadcast %cst_53 : f32 to vector<18x1xf32>
    %166 = arith.divf %164, %165 : vector<18x1xf32>
    %cst_54 = arith.constant 9.99999974E-6 : f32
    %167 = vector.broadcast %cst_54 : f32 to vector<18x1xf32>
    %168 = arith.addf %166, %167 : vector<18x1xf32>
    %169 = math.rsqrt %168 : vector<18x1xf32>
    %170 = vector.broadcast %169 : vector<18x1xf32> to vector<18x32xf32>
    %171 = arith.mulf %161, %170 : vector<18x32xf32>
    %172 = arith.truncf %171 : vector<18x32xf32> to vector<18x32xbf16>
    %cst_55 = arith.constant dense<0.000000e+00> : vector<18x128xf32>
    %173 = tpu.matmul %172, %10, %cst_55 {dimension_numbers = #tpu.dot_dimension_numbers<[1], [0], [0], [1], [0, 0, 1, 1], [], []>} : vector<18x32xbf16>, vector<32x128xbf16>, vector<18x128xf32> -> vector<18x128xf32>
    %cst_56 = arith.constant 0.000000e+00 : f32
    %174 = vector.broadcast %cst_56 : f32 to vector<18x128xf32>
    %175 = arith.maximumf %173, %174 : vector<18x128xf32>
    %176 = arith.truncf %175 : vector<18x128xf32> to vector<18x128xbf16>
    %cst_57 = arith.constant dense<0.000000e+00> : vector<18x32xf32>
    %177 = tpu.matmul %176, %12, %cst_57 {dimension_numbers = #tpu.dot_dimension_numbers<[1], [0], [0], [1], [0, 0, 1, 1], [], []>} : vector<18x128xbf16>, vector<128x32xbf16>, vector<18x32xf32> -> vector<18x32xf32>
    %178 = arith.addf %155, %177 : vector<18x32xf32>
    %cst_58 = arith.constant dense<0.000000e+00> : vector<18xf32>
    %179 = vector.multi_reduction <add>, %178, %cst_58 [1] : vector<18x32xf32> to vector<18xf32>
    %180 = vector.shape_cast %179 : vector<18xf32> to vector<18x1xf32>
    %cst_59 = arith.constant 3.200000e+01 : f32
    %181 = vector.broadcast %cst_59 : f32 to vector<18x1xf32>
    %182 = arith.divf %180, %181 : vector<18x1xf32>
    %183 = vector.broadcast %182 : vector<18x1xf32> to vector<18x32xf32>
    %184 = arith.subf %178, %183 : vector<18x32xf32>
    %185 = arith.mulf %184, %184 : vector<18x32xf32>
    %cst_60 = arith.constant dense<0.000000e+00> : vector<18xf32>
    %186 = vector.multi_reduction <add>, %185, %cst_60 [1] : vector<18x32xf32> to vector<18xf32>
    %187 = vector.shape_cast %186 : vector<18xf32> to vector<18x1xf32>
    %cst_61 = arith.constant 3.200000e+01 : f32
    %188 = vector.broadcast %cst_61 : f32 to vector<18x1xf32>
    %189 = arith.divf %187, %188 : vector<18x1xf32>
    %cst_62 = arith.constant 9.99999974E-6 : f32
    %190 = vector.broadcast %cst_62 : f32 to vector<18x1xf32>
    %191 = arith.addf %189, %190 : vector<18x1xf32>
    %192 = math.rsqrt %191 : vector<18x1xf32>
    %193 = vector.broadcast %192 : vector<18x1xf32> to vector<18x32xf32>
    %194 = arith.mulf %184, %193 : vector<18x32xf32>
    %195 = arith.truncf %194 : vector<18x32xf32> to vector<18x32xbf16>
    %cst_63 = arith.constant dense<0.000000e+00> : vector<18x96xf32>
    %196 = tpu.matmul %195, %4, %cst_63 {dimension_numbers = #tpu.dot_dimension_numbers<[1], [0], [0], [1], [0, 0, 1, 1], [], []>} : vector<18x32xbf16>, vector<32x96xbf16>, vector<18x96xf32> -> vector<18x96xf32>
    %197 = vector.broadcast %5 : vector<1x96xf32> to vector<18x96xf32>
    %198 = arith.addf %196, %197 : vector<18x96xf32>
    %199 = vector.extract_strided_slice %198 {offsets = [0, 0], sizes = [18, 8], strides = [1, 1]} : vector<18x96xf32> to vector<18x8xf32>
    %200 = arith.truncf %199 : vector<18x8xf32> to vector<18x8xbf16>
    %201 = vector.extract_strided_slice %198 {offsets = [0, 32], sizes = [18, 8], strides = [1, 1]} : vector<18x96xf32> to vector<18x8xf32>
    %202 = arith.truncf %201 : vector<18x8xf32> to vector<18x8xbf16>
    %203 = vector.extract_strided_slice %198 {offsets = [0, 64], sizes = [18, 8], strides = [1, 1]} : vector<18x96xf32> to vector<18x8xf32>
    %204 = arith.truncf %203 : vector<18x8xf32> to vector<18x8xbf16>
    "tpu.trace_start"() <{level = 10 : i32, message = "qe,ke->qk"}> : () -> ()
    %cst_64 = arith.constant dense<0.000000e+00> : vector<18x18xf32>
    %205 = tpu.matmul %200, %202, %cst_64 {dimension_numbers = #tpu.dot_dimension_numbers<[1], [1], [0], [0], [0, 0, 1, 0], [], []>} : vector<18x8xbf16>, vector<18x8xbf16>, vector<18x18xf32> -> vector<18x18xf32>
    "tpu.trace_stop"() : () -> ()
    %cst_65 = arith.constant 0.353553385 : f32
    %206 = vector.broadcast %cst_65 : f32 to vector<18x18xf32>
    %207 = arith.mulf %205, %206 : vector<18x18xf32>
    %cst_66 = arith.constant -1.000000e+30 : f32
    %208 = vector.broadcast %cst_66 : f32 to vector<18x18xf32>
    %209 = arith.select %37, %207, %208 : vector<18x18xi1>, vector<18x18xf32>
    %cst_67 = arith.constant dense<0xFF800000> : vector<18xf32>
    %210 = vector.multi_reduction <maximumf>, %209, %cst_67 [1] : vector<18x18xf32> to vector<18xf32>
    %211 = vector.shape_cast %210 : vector<18xf32> to vector<18x1xf32>
    %212 = vector.broadcast %211 : vector<18x1xf32> to vector<18x18xf32>
    %213 = arith.subf %209, %212 : vector<18x18xf32>
    %214 = math.exp %213 : vector<18x18xf32>
    %cst_68 = arith.constant dense<0.000000e+00> : vector<18xf32>
    %215 = vector.multi_reduction <add>, %214, %cst_68 [1] : vector<18x18xf32> to vector<18xf32>
    %216 = vector.shape_cast %215 : vector<18xf32> to vector<18x1xf32>
    %217 = tpu.reciprocal %216 {approx = true} : vector<18x1xf32> -> vector<18x1xf32>
    %218 = vector.broadcast %217 : vector<18x1xf32> to vector<18x18xf32>
    %219 = arith.mulf %214, %218 : vector<18x18xf32>
    %220 = arith.truncf %219 : vector<18x18xf32> to vector<18x18xbf16>
    %cst_69 = arith.constant dense<0.000000e+00> : vector<18x8xf32>
    %221 = tpu.matmul %220, %204, %cst_69 {dimension_numbers = #tpu.dot_dimension_numbers<[1], [0], [0], [1], [0, 0, 1, 1], [], []>} : vector<18x18xbf16>, vector<18x8xbf16>, vector<18x8xf32> -> vector<18x8xf32>
    %222 = vector.extract_strided_slice %198 {offsets = [0, 8], sizes = [18, 8], strides = [1, 1]} : vector<18x96xf32> to vector<18x8xf32>
    %223 = arith.truncf %222 : vector<18x8xf32> to vector<18x8xbf16>
    %224 = vector.extract_strided_slice %198 {offsets = [0, 40], sizes = [18, 8], strides = [1, 1]} : vector<18x96xf32> to vector<18x8xf32>
    %225 = arith.truncf %224 : vector<18x8xf32> to vector<18x8xbf16>
    %226 = vector.extract_strided_slice %198 {offsets = [0, 72], sizes = [18, 8], strides = [1, 1]} : vector<18x96xf32> to vector<18x8xf32>
    %227 = arith.truncf %226 : vector<18x8xf32> to vector<18x8xbf16>
    "tpu.trace_start"() <{level = 10 : i32, message = "qe,ke->qk"}> : () -> ()
    %cst_70 = arith.constant dense<0.000000e+00> : vector<18x18xf32>
    %228 = tpu.matmul %223, %225, %cst_70 {dimension_numbers = #tpu.dot_dimension_numbers<[1], [1], [0], [0], [0, 0, 1, 0], [], []>} : vector<18x8xbf16>, vector<18x8xbf16>, vector<18x18xf32> -> vector<18x18xf32>
    "tpu.trace_stop"() : () -> ()
    %cst_71 = arith.constant 0.353553385 : f32
    %229 = vector.broadcast %cst_71 : f32 to vector<18x18xf32>
    %230 = arith.mulf %228, %229 : vector<18x18xf32>
    %cst_72 = arith.constant -1.000000e+30 : f32
    %231 = vector.broadcast %cst_72 : f32 to vector<18x18xf32>
    %232 = arith.select %37, %230, %231 : vector<18x18xi1>, vector<18x18xf32>
    %cst_73 = arith.constant dense<0xFF800000> : vector<18xf32>
    %233 = vector.multi_reduction <maximumf>, %232, %cst_73 [1] : vector<18x18xf32> to vector<18xf32>
    %234 = vector.shape_cast %233 : vector<18xf32> to vector<18x1xf32>
    %235 = vector.broadcast %234 : vector<18x1xf32> to vector<18x18xf32>
    %236 = arith.subf %232, %235 : vector<18x18xf32>
    %237 = math.exp %236 : vector<18x18xf32>
    %cst_74 = arith.constant dense<0.000000e+00> : vector<18xf32>
    %238 = vector.multi_reduction <add>, %237, %cst_74 [1] : vector<18x18xf32> to vector<18xf32>
    %239 = vector.shape_cast %238 : vector<18xf32> to vector<18x1xf32>
    %240 = tpu.reciprocal %239 {approx = true} : vector<18x1xf32> -> vector<18x1xf32>
    %241 = vector.broadcast %240 : vector<18x1xf32> to vector<18x18xf32>
    %242 = arith.mulf %237, %241 : vector<18x18xf32>
    %243 = arith.truncf %242 : vector<18x18xf32> to vector<18x18xbf16>
    %cst_75 = arith.constant dense<0.000000e+00> : vector<18x8xf32>
    %244 = tpu.matmul %243, %227, %cst_75 {dimension_numbers = #tpu.dot_dimension_numbers<[1], [0], [0], [1], [0, 0, 1, 1], [], []>} : vector<18x18xbf16>, vector<18x8xbf16>, vector<18x8xf32> -> vector<18x8xf32>
    %245 = vector.extract_strided_slice %198 {offsets = [0, 16], sizes = [18, 8], strides = [1, 1]} : vector<18x96xf32> to vector<18x8xf32>
    %246 = arith.truncf %245 : vector<18x8xf32> to vector<18x8xbf16>
    %247 = vector.extract_strided_slice %198 {offsets = [0, 48], sizes = [18, 8], strides = [1, 1]} : vector<18x96xf32> to vector<18x8xf32>
    %248 = arith.truncf %247 : vector<18x8xf32> to vector<18x8xbf16>
    %249 = vector.extract_strided_slice %198 {offsets = [0, 80], sizes = [18, 8], strides = [1, 1]} : vector<18x96xf32> to vector<18x8xf32>
    %250 = arith.truncf %249 : vector<18x8xf32> to vector<18x8xbf16>
    "tpu.trace_start"() <{level = 10 : i32, message = "qe,ke->qk"}> : () -> ()
    %cst_76 = arith.constant dense<0.000000e+00> : vector<18x18xf32>
    %251 = tpu.matmul %246, %248, %cst_76 {dimension_numbers = #tpu.dot_dimension_numbers<[1], [1], [0], [0], [0, 0, 1, 0], [], []>} : vector<18x8xbf16>, vector<18x8xbf16>, vector<18x18xf32> -> vector<18x18xf32>
    "tpu.trace_stop"() : () -> ()
    %cst_77 = arith.constant 0.353553385 : f32
    %252 = vector.broadcast %cst_77 : f32 to vector<18x18xf32>
    %253 = arith.mulf %251, %252 : vector<18x18xf32>
    %cst_78 = arith.constant -1.000000e+30 : f32
    %254 = vector.broadcast %cst_78 : f32 to vector<18x18xf32>
    %255 = arith.select %37, %253, %254 : vector<18x18xi1>, vector<18x18xf32>
    %cst_79 = arith.constant dense<0xFF800000> : vector<18xf32>
    %256 = vector.multi_reduction <maximumf>, %255, %cst_79 [1] : vector<18x18xf32> to vector<18xf32>
    %257 = vector.shape_cast %256 : vector<18xf32> to vector<18x1xf32>
    %258 = vector.broadcast %257 : vector<18x1xf32> to vector<18x18xf32>
    %259 = arith.subf %255, %258 : vector<18x18xf32>
    %260 = math.exp %259 : vector<18x18xf32>
    %cst_80 = arith.constant dense<0.000000e+00> : vector<18xf32>
    %261 = vector.multi_reduction <add>, %260, %cst_80 [1] : vector<18x18xf32> to vector<18xf32>
    %262 = vector.shape_cast %261 : vector<18xf32> to vector<18x1xf32>
    %263 = tpu.reciprocal %262 {approx = true} : vector<18x1xf32> -> vector<18x1xf32>
    %264 = vector.broadcast %263 : vector<18x1xf32> to vector<18x18xf32>
    %265 = arith.mulf %260, %264 : vector<18x18xf32>
    %266 = arith.truncf %265 : vector<18x18xf32> to vector<18x18xbf16>
    %cst_81 = arith.constant dense<0.000000e+00> : vector<18x8xf32>
    %267 = tpu.matmul %266, %250, %cst_81 {dimension_numbers = #tpu.dot_dimension_numbers<[1], [0], [0], [1], [0, 0, 1, 1], [], []>} : vector<18x18xbf16>, vector<18x8xbf16>, vector<18x8xf32> -> vector<18x8xf32>
    %268 = vector.extract_strided_slice %198 {offsets = [0, 24], sizes = [18, 8], strides = [1, 1]} : vector<18x96xf32> to vector<18x8xf32>
    %269 = arith.truncf %268 : vector<18x8xf32> to vector<18x8xbf16>
    %270 = vector.extract_strided_slice %198 {offsets = [0, 56], sizes = [18, 8], strides = [1, 1]} : vector<18x96xf32> to vector<18x8xf32>
    %271 = arith.truncf %270 : vector<18x8xf32> to vector<18x8xbf16>
    %272 = vector.extract_strided_slice %198 {offsets = [0, 88], sizes = [18, 8], strides = [1, 1]} : vector<18x96xf32> to vector<18x8xf32>
    %273 = arith.truncf %272 : vector<18x8xf32> to vector<18x8xbf16>
    "tpu.trace_start"() <{level = 10 : i32, message = "qe,ke->qk"}> : () -> ()
    %cst_82 = arith.constant dense<0.000000e+00> : vector<18x18xf32>
    %274 = tpu.matmul %269, %271, %cst_82 {dimension_numbers = #tpu.dot_dimension_numbers<[1], [1], [0], [0], [0, 0, 1, 0], [], []>} : vector<18x8xbf16>, vector<18x8xbf16>, vector<18x18xf32> -> vector<18x18xf32>
    "tpu.trace_stop"() : () -> ()
    %cst_83 = arith.constant 0.353553385 : f32
    %275 = vector.broadcast %cst_83 : f32 to vector<18x18xf32>
    %276 = arith.mulf %274, %275 : vector<18x18xf32>
    %cst_84 = arith.constant -1.000000e+30 : f32
    %277 = vector.broadcast %cst_84 : f32 to vector<18x18xf32>
    %278 = arith.select %37, %276, %277 : vector<18x18xi1>, vector<18x18xf32>
    %cst_85 = arith.constant dense<0xFF800000> : vector<18xf32>
    %279 = vector.multi_reduction <maximumf>, %278, %cst_85 [1] : vector<18x18xf32> to vector<18xf32>
    %280 = vector.shape_cast %279 : vector<18xf32> to vector<18x1xf32>
    %281 = vector.broadcast %280 : vector<18x1xf32> to vector<18x18xf32>
    %282 = arith.subf %278, %281 : vector<18x18xf32>
    %283 = math.exp %282 : vector<18x18xf32>
    %cst_86 = arith.constant dense<0.000000e+00> : vector<18xf32>
    %284 = vector.multi_reduction <add>, %283, %cst_86 [1] : vector<18x18xf32> to vector<18xf32>
    %285 = vector.shape_cast %284 : vector<18xf32> to vector<18x1xf32>
    %286 = tpu.reciprocal %285 {approx = true} : vector<18x1xf32> -> vector<18x1xf32>
    %287 = vector.broadcast %286 : vector<18x1xf32> to vector<18x18xf32>
    %288 = arith.mulf %283, %287 : vector<18x18xf32>
    %289 = arith.truncf %288 : vector<18x18xf32> to vector<18x18xbf16>
    %cst_87 = arith.constant dense<0.000000e+00> : vector<18x8xf32>
    %290 = tpu.matmul %289, %273, %cst_87 {dimension_numbers = #tpu.dot_dimension_numbers<[1], [0], [0], [1], [0, 0, 1, 1], [], []>} : vector<18x18xbf16>, vector<18x8xbf16>, vector<18x8xf32> -> vector<18x8xf32>
    %291 = tpu.concatenate %221, %244, %267, %290 in 1 : vector<18x8xf32>, vector<18x8xf32>, vector<18x8xf32>, vector<18x8xf32> -> vector<18x32xf32>
    %292 = arith.truncf %291 : vector<18x32xf32> to vector<18x32xbf16>
    %cst_88 = arith.constant dense<0.000000e+00> : vector<18x32xf32>
    %293 = tpu.matmul %292, %7, %cst_88 {dimension_numbers = #tpu.dot_dimension_numbers<[1], [0], [0], [1], [0, 0, 1, 1], [], []>} : vector<18x32xbf16>, vector<32x32xbf16>, vector<18x32xf32> -> vector<18x32xf32>
    %294 = vector.broadcast %8 : vector<1x32xf32> to vector<18x32xf32>
    %295 = arith.addf %293, %294 : vector<18x32xf32>
    %296 = arith.addf %295, %178 : vector<18x32xf32>
    %cst_89 = arith.constant dense<0.000000e+00> : vector<18xf32>
    %297 = vector.multi_reduction <add>, %296, %cst_89 [1] : vector<18x32xf32> to vector<18xf32>
    %298 = vector.shape_cast %297 : vector<18xf32> to vector<18x1xf32>
    %cst_90 = arith.constant 3.200000e+01 : f32
    %299 = vector.broadcast %cst_90 : f32 to vector<18x1xf32>
    %300 = arith.divf %298, %299 : vector<18x1xf32>
    %301 = vector.broadcast %300 : vector<18x1xf32> to vector<18x32xf32>
    %302 = arith.subf %296, %301 : vector<18x32xf32>
    %303 = arith.mulf %302, %302 : vector<18x32xf32>
    %cst_91 = arith.constant dense<0.000000e+00> : vector<18xf32>
    %304 = vector.multi_reduction <add>, %303, %cst_91 [1] : vector<18x32xf32> to vector<18xf32>
    %305 = vector.shape_cast %304 : vector<18xf32> to vector<18x1xf32>
    %cst_92 = arith.constant 3.200000e+01 : f32
    %306 = vector.broadcast %cst_92 : f32 to vector<18x1xf32>
    %307 = arith.divf %305, %306 : vector<18x1xf32>
    %cst_93 = arith.constant 9.99999974E-6 : f32
    %308 = vector.broadcast %cst_93 : f32 to vector<18x1xf32>
    %309 = arith.addf %307, %308 : vector<18x1xf32>
    %310 = math.rsqrt %309 : vector<18x1xf32>
    %311 = vector.broadcast %310 : vector<18x1xf32> to vector<18x32xf32>
    %312 = arith.mulf %302, %311 : vector<18x32xf32>
    %313 = arith.truncf %312 : vector<18x32xf32> to vector<18x32xbf16>
    %cst_94 = arith.constant dense<0.000000e+00> : vector<18x128xf32>
    %314 = tpu.matmul %313, %10, %cst_94 {dimension_numbers = #tpu.dot_dimension_numbers<[1], [0], [0], [1], [0, 0, 1, 1], [], []>} : vector<18x32xbf16>, vector<32x128xbf16>, vector<18x128xf32> -> vector<18x128xf32>
    %cst_95 = arith.constant 0.000000e+00 : f32
    %315 = vector.broadcast %cst_95 : f32 to vector<18x128xf32>
    %316 = arith.maximumf %314, %315 : vector<18x128xf32>
    %317 = arith.truncf %316 : vector<18x128xf32> to vector<18x128xbf16>
    %cst_96 = arith.constant dense<0.000000e+00> : vector<18x32xf32>
    %318 = tpu.matmul %317, %12, %cst_96 {dimension_numbers = #tpu.dot_dimension_numbers<[1], [0], [0], [1], [0, 0, 1, 1], [], []>} : vector<18x128xbf16>, vector<128x32xbf16>, vector<18x32xf32> -> vector<18x32xf32>
    %319 = arith.addf %296, %318 : vector<18x32xf32>
    %c0_97 = arith.constant 0 : index
    %c0_98 = arith.constant 0 : index
    %320 = vector.load %arg8[%c0_97, %c0_98] : memref<18x32xf32, #tpu.memory_space<vmem>>, vector<18x32xf32>
    tpu.vector_store %arg8[%c0_97, %c0_98], %319 {strides = array<i32>} : memref<18x32xf32, #tpu.memory_space<vmem>>, vector<18x32xf32>,
    return
  }
}

</mosaic_0001>

<bundles_post_ra>
// kernel: tpu_custom_call.1
= control target key start
LH: loop header
LB: loop body
LE: loop exit
PB: predicated region body
PF: predicated region fallthrough
CT: control target
= control target key end

     0   :  { %vm123_vm0 = vcmask 261120   ;;  %vm130_vm1 = vcmask 254976   ;;  %s3562_s0 = inlined_call_operand.vmem [shape: f32[18,32], index: 0, kind: input, shape index: {}]   ;;  %s3563_s1 = inlined_call_operand.vmem [shape: f32[18,32], index: 1, kind: input, shape index: {}]   ;;  %s3564_s2 = inlined_call_operand.vmem [shape: f32[32,96], index: 2, kind: input, shape index: {}]   ;;  %s3565_s3 = inlined_call_operand.vmem [shape: f32[1,96], index: 3, kind: input, shape index: {}]   ;;  %s3566_s4 = inlined_call_operand.vmem [shape: f32[32,32], index: 4, kind: input, shape index: {}]   ;;  %s3567_s5 = inlined_call_operand.vmem [shape: f32[1,32], index: 5, kind: input, shape index: {}]   ;;  %s3568_s6 = inlined_call_operand.vmem [shape: f32[32,128], index: 6, kind: input, shape index: {}]   ;;  %s3569_s7 = inlined_call_operand.vmem [shape: f32[128,32], index: 7, kind: input, shape index: {}]   ;;  %s3570_s8 = inlined_call_operand.hbm [shape: f32[18,32], index: 8, kind: output, shape index: {}]  }
   0x1   :  { %v31_v0 = vld [vmem:[%s3562_s0] sm:$0xff]  ;;  %v33_v2 = vld [vmem:[%s3562_s0 + $0x10] sm:$0x3]  ;;  %v32_v5 = vld [vmem:[%s3562_s0 + $0x8] sm:$0xff] }
   0x2   :  { %v34_v1 = vld [vmem:[%s3563_s1] sm:$0xff]  ;;  %v36_v4 = vld [vmem:[%s3563_s1 + $0x10] sm:$0x3]  ;;  %v35_v6 = vld [vmem:[%s3563_s1 + $0x8] sm:$0xff] }
   0x3   :  { %v2885_v3 = vadd.f32 %v34_v1, %v31_v0  ;;  %v2896_v7 = vadd.f32 %v36_v4, %v33_v2  ;;  %v2898_v8 = vadd.f32 %v35_v6, %v32_v5 }
   0x4   :  { %13 = vsyncpa [#allocation3], 0  ;;  %v42_v27 = vld [vmem:[%s3564_s2 + $0x10] sm:$0xff]  ;;  %v43_v28 = vld [vmem:[%s3564_s2 + $0x18] sm:$0xff]  ;;  %s2815_s24 = smov 96   ;;  %vm235_vm2 = vcmask 64512  }
   0x5   :  { %v124_v9 = vsel %vm123_vm0, %v2885_v3, 0.0  ;;  %v131_v10 = vsel %vm130_vm1, %v2896_v7, 0.0  ;;  %v127_v11 = vsel %vm123_vm0, %v2898_v8, 0.0  ;;  %v40_v29 = vld [vmem:[%s3564_s2] sm:$0xff]  ;;  %v2921_v30 = vpack.c.bf16 %v43_v28, %v42_v27  ;;  %v41_v31 = vld [vmem:[%s3564_s2 + $0x8] sm:$0xff]  ;;  %s2816_s25 = smov 120  }
   0x6   :  { %125 = vadd.xlane.f32.xlu0 %v124_v9  ;;  %132 = vadd.xlane.f32.xlu1 %v131_v10  ;;  %v2926_v32 = vpack.c.bf16 %v41_v31, %v40_v29  ;;  %v2231_v50 = vld [vmem:[%s3565_s3] ss:$0 sm:$0xff]  ;;  %s2817_s26 = smov 88   ;;  %vm302_vm11 = vcmask 146432   ;;  %vm309_vm15 = vcmask 140288   ;;  %s2818_s27 = smov 56  }
   0x7   :  { %2385 = vmatprep.subr.bf16.mxu0 %v2921_v30  ;;  %s2819_s28 = smov 80   ;;  %s2820_s29 = smov 112  }
   0x8   :  { %2386 = vmatpush3.bf16.msra.mxu0 %v2921_v30  ;;  %s2821_s30 = smov 64   ;;  %s2822_s9 = smov 48  }
   0x9   :  { %2387 = vmatprep.subr.bf16.mxu0 %v2926_v32  ;;  %s2823_s10 = smov 72   ;;  %s2824_s11 = smov 104  }
   0xa   :  { %128 = vadd.xlane.f32.xlu0 %v127_v11  ;;  %s2825_s12 = smov 40   ;;  %s2826_s13 = smov 8  }
   0xb   :  { %s2827_s14 = smov 16   ;;  %s2828_s21 = smov 24  }
   0xc   :  { %2388 = vmatpush3.bf16.msra.mxu0 %v2926_v32 }
  0x8f   :  { %v126_v12 = vpop.xlane.xlu0 %125  ;;  %v133_v14 = vpop.xlane.xlu1 %132 }
  0x90   :  { %v135_v13 = vmul.f32 0.03125, %v126_v12  ;;  %v137_v15 = vmul.f32 0.03125, %v133_v14  ;;  %v84_v12 = vlaneseq }
  0x92   :  { %v138_v16 = vsub.f32 %v2885_v3, %v135_v13  ;;  %v140_v17 = vsub.f32 %v2896_v7, %v137_v15  ;;  %v85_v13 = vshrl.u32 %v84_v12, 7  ;;  %v2971_v14 = vand.u32 127, %v84_v12 }
  0x93   :  { %v129_v18 = vpop.xlane.xlu0 %128 }
  0x94   :  { %v136_v19 = vmul.f32 0.03125, %v129_v18  ;;  %v141_v20 = vmul.f32 %v138_v16, %v138_v16  ;;  %v143_v21 = vmul.f32 %v140_v17, %v140_v17  ;;  %v86_v15 = vadd.s32 8, %v85_v13 }
  0x95   :  { %vm114_vm3 = vcmp.ge.s32.totalorder %v2971_v14, 9  ;;  %vm115_vm4 = vcmp.lt.s32.totalorder %v2971_v14, 18  ;;  %vm100_vm7 = vcmp.lt.s32.totalorder %v2971_v14, 9 }
  0x96   :  { %v139_v22 = vsub.f32 %v2898_v8, %v136_v19  ;;  %v144_v23 = vsel %vm123_vm0, %v141_v20, 0.0  ;;  %v150_v24 = vsel %vm130_vm1, %v143_v21, 0.0  ;;  %vm94_vm5 = vcmp.lt.s32.totalorder %v86_v15, 9  ;;  %vm116_vm9 = vmand %vm114_vm3, %vm115_vm4 }
  0x97   :  { %145 = vadd.xlane.f32.xlu1 %v144_v23  ;;  %vm106_vm6 = vcmp.ge.s32.totalorder %v86_v15, 9  ;;  %vm103_vm10 = vmand %vm94_vm5, %vm100_vm7  ;;  %vm350_vm3 = vcmask 1040384   ;;  %vm954_vm4 = vcmask 130048   ;;  %vm958_vm5 = vcmask 195584  }
  0x98   :  { %v142_v25 = vmul.f32 %v139_v22, %v139_v22  ;;  %vm118_vm12 = vmand %vm106_vm6, %vm116_vm9 }
  0x99   :  { %vm2989_vm14 = vmor %vm103_vm10, %vm118_vm12 }
  0x9a   :  { %v147_v26 = vsel %vm123_vm0, %v142_v25, 0.0 }
  0x9b   :  { %151 = vadd.xlane.f32.xlu1 %v150_v24  ;;  %148 = vadd.xlane.f32.xlu0 %v147_v26 }
 0x120   :  { %v146_v33 = vpop.xlane.xlu1 %145 }
 0x121   :  { %v153_v34 = vmul.f32 0.03125, %v146_v33 }
 0x123   :  { %v156_v35 = vadd.f32 1e-05, %v153_v34 }
 0x124   :  { %v152_v36 = vpop.xlane.xlu1 %151  ;;  %v149_v37 = vpop.xlane.xlu0 %148 }
 0x125   :  { %v155_v38 = vmul.f32 0.03125, %v152_v36  ;;  %v154_v39 = vmul.f32 0.03125, %v149_v37  ;;  %2671 = vrsqrt.f32 %v156_v35 }
 0x127   :  { %v158_v40 = vadd.f32 1e-05, %v155_v38  ;;  %v157_v41 = vadd.f32 1e-05, %v154_v39 }
 0x129   :  { %2673 = vrsqrt.f32 %v158_v40 }
 0x12a   :  { %2675 = vrsqrt.f32 %v157_v41 }
 0x132   :  { %v2672_v42 = vpop.eup %2671 }
 0x133   :  { %v162_v46 = vmul.f32 %v2672_v42, %v138_v16 }
 0x136   :  { %v2674_v43 = vpop.eup %2673 }
 0x137   :  { %v2676_v44 = vpop.eup %2675  ;;  %v164_v45 = vmul.f32 %v2674_v43, %v140_v17  ;;  %v87_v17 = vadd.s32 16, %v85_v13 }
 0x138   :  { %v163_v47 = vmul.f32 %v2676_v44, %v139_v22 }
 0x139   :  { %v166_v48 = vpack.c.bf16 %v164_v45, %v164_v45  ;;  %vm110_vm8 = vcmp.lt.s32.totalorder %v87_v17, 18 }
 0x13a   :  { %v165_v49 = vpack.c.bf16 %v163_v47, %v162_v46  ;;  %vm2983_vm13 = vmand %vm110_vm8, %vm116_vm9 }
 0x13c   :  { %2389 = vmatprep.mubr.msk.bf16.mxu0 %vm123_vm0, %v165_v49 }
 0x13d   :  { %2390 = vmatmul.mubr.msk.bf16.vlgmr.msra.gmra.mxu0 %vm123_vm0, %v166_v48 }
 0x1fd   :  { %v2391_v51 = vpop.f32.mrf.mxu0 }
 0x1fe   :  { %v222_v52 = vadd.f32 %v2391_v51, %v2231_v50 }
 0x1ff   :  { %v213_v53 = vpop.f32.mrf.mxu0 }
 0x200   :  { %v2937_v54 = vpack.c.bf16 %v222_v52, %v222_v52  ;;  %v214_v57 = vadd.f32 %v2231_v50, %v213_v53 }
 0x201   :  { %v2392_v55 = vpop.f32.mrf.mxu0 }
 0x202   :  { %233 = vrot.lane.b32.xlu0 %v2937_v54, %s2815_s24 }
 0x203   :  { %v216_v56 = vpop.f32.mrf.mxu0 }
 0x204   :  { %v217_v58 = vadd.f32 %v2231_v50, %v216_v56 }
 0x206   :  { %v2941_v59 = vpack.c.bf16 %v217_v58, %v214_v57 }
 0x208   :  { %402 = vrot.lane.b32.xlu0 %v2941_v59, %s2816_s25  ;;  %231 = vrot.lane.b32.xlu1 %v2941_v59, %s2815_s24 }
 0x209   :  { %2397 = vmatprep.mubr.msk.bf16.mxu1 %vm235_vm2, %v2941_v59 }
 0x20c   :  { %408 = vrot.lane.b32.xlu1 %v2937_v54, %s2817_s26 }
 0x210   :  { %406 = vrot.lane.b32.xlu1 %v2941_v59, %s2817_s26 }
 0x214   :  { %404 = vrot.lane.b32.xlu1 %v2937_v54, %s2816_s25 }
 0x274   :  { %v234_v60 = vpop.permute.xlu0 %233 }
 0x275   :  { %2601 = vmatprep.subr.msk.bf16.mxu1 %vm235_vm2, %v234_v60  ;;  %v246_v61 = vsel %vm235_vm2, %v234_v60, 0 }
 0x276   :  { %2394 = vmatpush3.bf16.xpose.msra.mxu1 %v246_v61 }
 0x27a   :  { %v232_v62 = vpop.permute.xlu1 %231  ;;  %v403_v1 = vpop.permute.xlu0 %402 }
 0x27b   :  { %2602 = vmatprep.subr.msk.bf16.mxu1 %vm235_vm2, %v232_v62  ;;  %v243_v63 = vsel %vm235_vm2, %v232_v62, 0 }
 0x27e   :  { %2396 = vmatpush3.bf16.xpose.msra.mxu1 %v243_v63  ;;  %v409_v0 = vpop.permute.xlu1 %408 }
 0x27f   :  { %2604 = vmatprep.subr.msk.bf16.mxu1 %vm235_vm2, %v409_v0  ;;  %v420_v2 = vsel %vm235_vm2, %v409_v0, 0 }
 0x282   :  { %v407_v4 = vpop.permute.xlu1 %406 }
 0x283   :  { %v417_v5 = vsel %vm235_vm2, %v407_v4, 0 }
 0x285   :  { %2398 = vmatmul.mubr.msk.bf16.vlgmr.msra.gmra.mxu1 %vm235_vm2, %v2937_v54 }
 0x286   :  { %2410 = vmatpush3.bf16.xpose.msra.mxu1 %v420_v2  ;;  %2413 = vmatprep.mubr.msk.bf16.mxu1 %vm235_vm2, %v403_v1  ;;  %v405_v6 = vpop.permute.xlu1 %404 }
 0x287   :  { %2605 = vmatprep.subr.msk.bf16.mxu1 %vm235_vm2, %v407_v4 }
 0x28e   :  { %2412 = vmatpush3.bf16.xpose.msra.mxu1 %v417_v5 }
 0x295   :  { %2414 = vmatmul.mubr.msk.bf16.vlgmr.msra.gmra.mxu1 %vm235_vm2, %v405_v6 }
 0x345   :  { %v2967_v9 = vpop.f32.mrf.mxu1 }
 0x346   :  { %v298_v51 = vmul.f32 0.35355338, %v2967_v9 }
 0x347   :  { %v2969_v10 = vpop.f32.mrf.mxu1 }
 0x348   :  { %v296_v50 = vmul.f32 0.35355338, %v2969_v10  ;;  %v301_v56 = vsel %vm2983_vm13, %v298_v51, -1e+30 }
 0x349   :  { %v2400_v11 = vpop.f32.mrf.mxu1  ;;  %v310_v57 = vsel %vm309_vm15, %v301_v56, -inf }
 0x34a   :  { %v299_v52 = vsel %vm100_vm7, %v296_v50, -1e+30 }
 0x34b   :  { %v2973_v16 = vpop.f32.mrf.mxu1  ;;  %v303_v55 = vsel %vm302_vm11, %v299_v52, -inf }
 0x34c   :  { %v297_v53 = vmul.f32 0.35355338, %v2973_v16 }
 0x34e   :  { %v300_v58 = vsel %vm2989_vm14, %v297_v53, -1e+30 }
 0x34f   :  { %v306_v60 = vsel %vm302_vm11, %v300_v58, -inf }
 0x355   :  { %v2415_v18 = vpop.f32.mrf.mxu1 }
 0x356   :  { %v472_v20 = vmul.f32 0.35355338, %v2415_v18 }
 0x357   :  { %v456_v19 = vpop.f32.mrf.mxu1 }
 0x358   :  { %v470_v21 = vmul.f32 0.35355338, %v456_v19  ;;  %v475_v28 = vsel %vm2983_vm13, %v472_v20, -1e+30 }
 0x359   :  { %v2416_v22 = vpop.f32.mrf.mxu1  ;;  %v482_v33 = vsel %vm309_vm15, %v475_v28, -inf }
 0x35a   :  { %v473_v23 = vsel %vm100_vm7, %v470_v21, -1e+30 }
 0x35b   :  { %v459_v24 = vpop.f32.mrf.mxu1  ;;  %v476_v25 = vsel %vm302_vm11, %v473_v23, -inf }
 0x35c   :  { %v471_v27 = vmul.f32 0.35355338, %v459_v24  ;;  %477 = vmax.xlane.f32.xlu0 %v476_v25 }
 0x35e   :  { %v474_v31 = vsel %vm2989_vm14, %v471_v27, -1e+30 }
 0x35f   :  { %v479_v34 = vsel %vm302_vm11, %v474_v31, -inf }
 0x360   :  { %483 = vmax.xlane.f32.xlu0 %v482_v33  ;;  %480 = vmax.xlane.f32.xlu1 %v479_v34 }
 0x3e5   :  { %v478_v35 = vpop.xlane.xlu0 %477 }
 0x3e6   :  { %v485_v36 = vsub.f32 %v473_v23, %v478_v35 }
 0x3e8   :  { %v488_v37 = vmul.f32 1.442695, %v485_v36 }
 0x3e9   :  { %v484_v38 = vpop.xlane.xlu0 %483  ;;  %v481_v39 = vpop.xlane.xlu1 %480 }
 0x3ea   :  { %2677 = vpow2.f32 %v488_v37  ;;  %v487_v40 = vsub.f32 %v475_v28, %v484_v38  ;;  %v486_v41 = vsub.f32 %v474_v31, %v481_v39 }
 0x3ec   :  { %v492_v42 = vmul.f32 1.442695, %v487_v40  ;;  %v490_v43 = vmul.f32 1.442695, %v486_v41 }
 0x3ee   :  { %2679 = vpow2.f32 %v492_v42 }
 0x3ef   :  { %2681 = vpow2.f32 %v490_v43 }
 0x3f7   :  { %v2678_v44 = vpop.eup %2677 }
 0x3f8   :  { %v494_v45 = vsel %vm302_vm11, %v2678_v44, 0.0 }
 0x3f9   :  { %495 = vadd.xlane.f32.xlu0 %v494_v45 }
 0x3fb   :  { %v2680_v46 = vpop.eup %2679 }
 0x3fc   :  { %v2682_v47 = vpop.eup %2681  ;;  %v500_v48 = vsel %vm309_vm15, %v2680_v46, 0.0 }
 0x3fd   :  { %501 = vadd.xlane.f32.xlu1 %v500_v48  ;;  %v497_v49 = vsel %vm302_vm11, %v2682_v47, 0.0 }
 0x3fe   :  { %498 = vadd.xlane.f32.xlu0 %v497_v49 }
 0x40e   :  { %511 = vrot.lane.b32.xlu1 %v2941_v59, %s2818_s27 }
 0x412   :  { %579 = vrot.lane.b32.xlu1 %v2937_v54, %s2819_s28 }
 0x414   :  { %513 = vrot.lane.b32.xlu0 %v2937_v54, %s2818_s27 }
 0x416   :  { %577 = vrot.lane.b32.xlu1 %v2941_v59, %s2819_s28 }
 0x418   :  { %573 = vrot.lane.b32.xlu0 %v2941_v59, %s2820_s29 }
 0x41a   :  { %575 = vrot.lane.b32.xlu1 %v2937_v54, %s2820_s29 }
 0x437   :  { %304 = vmax.xlane.f32.xlu0 %v303_v55 }
 0x43b   :  { %311 = vmax.xlane.f32.xlu0 %v310_v57 }
 0x43e   :  { %307 = vmax.xlane.f32.xlu1 %v306_v60 }
 0x482   :  { %v496_v61 = vpop.xlane.xlu0 %495 }
 0x483   :  { %2683 = vrcp.f32 %v496_v61 }
 0x486   :  { %v502_v62 = vpop.xlane.xlu1 %501 }
 0x487   :  { %v499_v63 = vpop.xlane.xlu0 %498  ;;  %2685 = vrcp.f32 %v502_v62 }
 0x488   :  { %2687 = vrcp.f32 %v499_v63 }
 0x48a   :  { %v512_v1 = vpop.permute.xlu1 %511 }
 0x48b   :  { %v514_v0 = vpop.permute.xlu0 %513 }
 0x48c   :  { %2606 = vmatprep.subr.msk.bf16.mxu1 %vm350_vm3, %v514_v0  ;;  %v523_v2 = vsel %vm350_vm3, %v514_v0, 0 }
 0x48d   :  { %2418 = vmatpush3.bf16.msra.mxu1 %v523_v2 }
 0x48e   :  { %2419 = vmatprep.subr.bf16.mxu1 %v512_v1  ;;  %v580_v4 = vpop.permute.xlu1 %579 }
 0x48f   :  { %v574_v16 = vpop.permute.xlu0 %573  ;;  %v591_v17 = vsel %vm235_vm2, %v580_v4, 0 }
 0x490   :  { %v2684_v5 = vpop.eup %2683 }
 0x491   :  { %2420 = vmatpush3.bf16.msra.mxu1 %v512_v1  ;;  %v506_v11 = vmul.f32 %v2684_v5, %v2678_v44 }
 0x492   :  { %2607 = vmatprep.subr.msk.bf16.mxu1 %vm235_vm2, %v580_v4  ;;  %v578_v18 = vpop.permute.xlu1 %577 }
 0x493   :  { %v588_v19 = vsel %vm235_vm2, %v578_v18, 0 }
 0x494   :  { %v2686_v6 = vpop.eup %2685 }
 0x495   :  { %v2688_v9 = vpop.eup %2687  ;;  %v508_v10 = vmul.f32 %v2686_v6, %v2680_v46 }
 0x496   :  { %v507_v12 = vmul.f32 %v2688_v9, %v2682_v47  ;;  %v576_v20 = vpop.permute.xlu1 %575 }
 0x497   :  { %v510_v13 = vpack.c.bf16 %v508_v10, %v508_v10 }
 0x498   :  { %v509_v15 = vpack.c.bf16 %v507_v12, %v506_v11 }
 0x49a   :  { %2421 = vmatprep.mubr.msk.bf16.mxu1 %vm302_vm11, %v509_v15 }
 0x49b   :  { %2422 = vmatmul.mubr.msk.bf16.vlgmr.msra.gmra.mxu1 %vm302_vm11, %v510_v13 }
 0x49c   :  { %2426 = vmatpush3.bf16.xpose.msra.mxu1 %v591_v17  ;;  %2429 = vmatprep.mubr.msk.bf16.mxu1 %vm235_vm2, %v574_v16 }
 0x49d   :  { %2608 = vmatprep.subr.msk.bf16.mxu1 %vm235_vm2, %v578_v18 }
 0x4a4   :  { %2428 = vmatpush3.bf16.xpose.msra.mxu1 %v588_v19 }
 0x4ab   :  { %2430 = vmatmul.mubr.msk.bf16.vlgmr.msra.gmra.mxu1 %vm235_vm2, %v576_v20 }
 0x4c0   :  { %v305_v24 = vpop.xlane.xlu0 %304 }
 0x4c1   :  { %v313_v31 = vsub.f32 %v299_v52, %v305_v24 }
 0x4c3   :  { %v316_v36 = vmul.f32 1.442695, %v313_v31 }
 0x4c4   :  { %v312_v34 = vpop.xlane.xlu0 %311 }
 0x4c5   :  { %v315_v37 = vsub.f32 %v301_v56, %v312_v34 }
 0x4c7   :  { %v308_v21 = vpop.xlane.xlu1 %307  ;;  %v320_v38 = vmul.f32 1.442695, %v315_v37 }
 0x4c8   :  { %v314_v22 = vsub.f32 %v300_v58, %v308_v21 }
 0x4ca   :  { %v318_v27 = vmul.f32 1.442695, %v314_v22 }
 0x4cc   :  { %2689 = vpow2.f32 %v318_v27 }
 0x4cd   :  { %2691 = vpow2.f32 %v316_v36 }
 0x4ce   :  { %2693 = vpow2.f32 %v320_v38 }
 0x4d9   :  { %v2690_v46 = vpop.eup %2689 }
 0x4da   :  { %v325_v51 = vsel %vm302_vm11, %v2690_v46, 0.0  ;;  %v2692_v55 = vpop.eup %2691 }
 0x4db   :  { %v322_v56 = vsel %vm302_vm11, %v2692_v55, 0.0  ;;  %v2694_v57 = vpop.eup %2693 }
 0x4dc   :  { %v328_v58 = vsel %vm309_vm15, %v2694_v57, 0.0 }
 0x55b   :  { %v3034_v23 = vpop.f32.mrf.mxu1 }
 0x55d   :  { %v3036_v25 = vpop.f32.mrf.mxu1 }
 0x55f   :  { %v2424_v28 = vpop.f32.mrf.mxu1 }
 0x561   :  { %v3038_v33 = vpop.f32.mrf.mxu1 }
 0x562   :  { %v2641_v35 = vpack.i.bf16 %v3038_v33, %v3036_v25 }
 0x56b   :  { %v2431_v39 = vpop.f32.mrf.mxu1 }
 0x56c   :  { %v643_v40 = vmul.f32 0.35355338, %v2431_v39 }
 0x56d   :  { %v627_v41 = vpop.f32.mrf.mxu1 }
 0x56e   :  { %v641_v42 = vmul.f32 0.35355338, %v627_v41  ;;  %v646_v43 = vsel %vm2983_vm13, %v643_v40, -1e+30 }
 0x56f   :  { %v2432_v44 = vpop.f32.mrf.mxu1  ;;  %v653_v45 = vsel %vm309_vm15, %v646_v43, -inf }
 0x570   :  { %654 = vmax.xlane.f32.xlu1 %v653_v45  ;;  %v644_v47 = vsel %vm100_vm7, %v641_v42, -1e+30 }
 0x571   :  { %v630_v48 = vpop.f32.mrf.mxu1  ;;  %v647_v49 = vsel %vm302_vm11, %v644_v47, -inf }
 0x572   :  { %v642_v50 = vmul.f32 0.35355338, %v630_v48  ;;  %648 = vmax.xlane.f32.xlu0 %v647_v49 }
 0x574   :  { %326 = vadd.xlane.f32.xlu1 %v325_v51  ;;  %v645_v52 = vsel %vm2989_vm14, %v642_v50, -1e+30 }
 0x575   :  { %v650_v53 = vsel %vm302_vm11, %v645_v52, -inf }
 0x576   :  { %651 = vmax.xlane.f32.xlu0 %v650_v53 }
 0x57a   :  { %323 = vadd.xlane.f32.xlu0 %v322_v56 }
 0x57e   :  { %329 = vadd.xlane.f32.xlu0 %v328_v58 }
 0x585   :  { %339 = vrot.lane.b32.xlu1 %v2941_v59, %s2821_s30 }
 0x589   :  { %684 = vrot.lane.b32.xlu1 %v2937_v54, %s2822_s9 }
 0x594   :  { %341 = vrot.lane.b32.xlu0 %v2937_v54, %s2821_s30 }
 0x5f9   :  { %v655_v60 = vpop.xlane.xlu1 %654 }
 0x5fa   :  { %v658_v61 = vsub.f32 %v646_v43, %v655_v60 }
 0x5fb   :  { %v649_v62 = vpop.xlane.xlu0 %648 }
 0x5fc   :  { %v663_v63 = vmul.f32 1.442695, %v658_v61  ;;  %v656_v0 = vsub.f32 %v644_v47, %v649_v62 }
 0x5fd   :  { %v327_v4 = vpop.xlane.xlu1 %326 }
 0x5fe   :  { %2695 = vpow2.f32 %v663_v63  ;;  %v659_v1 = vmul.f32 1.442695, %v656_v0 }
 0x5ff   :  { %v652_v2 = vpop.xlane.xlu0 %651 }
 0x600   :  { %2697 = vpow2.f32 %v659_v1  ;;  %v657_v5 = vsub.f32 %v645_v52, %v652_v2 }
 0x601   :  { %2699 = vrcp.f32 %v327_v4  ;;  %v340_v12 = vpop.permute.xlu1 %339 }
 0x602   :  { %v661_v6 = vmul.f32 1.442695, %v657_v5 }
 0x603   :  { %v324_v9 = vpop.xlane.xlu0 %323 }
 0x604   :  { %2701 = vpow2.f32 %v661_v6 }
 0x605   :  { %2703 = vrcp.f32 %v324_v9  ;;  %v685_v21 = vpop.permute.xlu1 %684 }
 0x606   :  { %v694_v38 = vsel %vm350_vm3, %v685_v21, 0 }
 0x607   :  { %v330_v10 = vpop.xlane.xlu0 %329 }
 0x608   :  { %2705 = vrcp.f32 %v330_v10 }
 0x60b   :  { %v2696_v11 = vpop.eup %2695  ;;  %v342_v13 = vpop.permute.xlu0 %341 }
 0x60c   :  { %v352_v15 = vsel %vm350_vm3, %v342_v13, 0  ;;  %2603 = vmatprep.subr.msk.bf16.mxu0 %vm350_vm3, %v342_v13  ;;  %v671_v16 = vsel %vm309_vm15, %v2696_v11, 0.0 }
 0x60d   :  { %v2698_v17 = vpop.eup %2697  ;;  %2402 = vmatpush3.bf16.msra.mxu0 %v352_v15  ;;  %672 = vadd.xlane.f32.xlu1 %v671_v16 }
 0x60e   :  { %2403 = vmatprep.subr.bf16.mxu0 %v340_v12  ;;  %v2700_v18 = vpop.eup %2699  ;;  %v665_v19 = vsel %vm302_vm11, %v2698_v17, 0.0 }
 0x60f   :  { %v335_v28 = vmul.f32 %v2700_v18, %v2690_v46 }
 0x611   :  { %v2702_v20 = vpop.eup %2701  ;;  %666 = vadd.xlane.f32.xlu1 %v665_v19  ;;  %2404 = vmatpush3.bf16.msra.mxu0 %v340_v12 }
 0x612   :  { %v2704_v22 = vpop.eup %2703  ;;  %2609 = vmatprep.subr.msk.bf16.mxu0 %vm350_vm3, %v685_v21  ;;  %v668_v24 = vsel %vm302_vm11, %v2702_v20, 0.0 }
 0x613   :  { %669 = vadd.xlane.f32.xlu0 %v668_v24  ;;  %v334_v27 = vmul.f32 %v2704_v22, %v2692_v55 }
 0x615   :  { %v2706_v31 = vpop.eup %2705  ;;  %v337_v34 = vpack.c.bf16 %v335_v28, %v334_v27 }
 0x616   :  { %v336_v36 = vmul.f32 %v2706_v31, %v2694_v57 }
 0x617   :  { %2405 = vmatprep.mubr.msk.bf16.mxu0 %vm302_vm11, %v337_v34 }
 0x618   :  { %v338_v37 = vpack.c.bf16 %v336_v36, %v336_v36 }
 0x61a   :  { %2406 = vmatmul.mubr.msk.bf16.vlgmr.msra.gmra.mxu0 %vm302_vm11, %v338_v37 }
 0x61b   :  { %2434 = vmatpush3.bf16.msra.mxu0 %v694_v38 }
 0x622   :  { %682 = vrot.lane.b32.xlu1 %v2941_v59, %s2822_s9 }
 0x626   :  { %748 = vrot.lane.b32.xlu1 %v2941_v59, %s2823_s10 }
 0x629   :  { %750 = vrot.lane.b32.xlu0 %v2937_v54, %s2823_s10 }
 0x62a   :  { %746 = vrot.lane.b32.xlu1 %v2937_v54, %s2824_s11 }
 0x62d   :  { %744 = vrot.lane.b32.xlu0 %v2941_v59, %s2824_s11 }
 0x696   :  { %v673_v39 = vpop.xlane.xlu1 %672 }
 0x697   :  { %2707 = vrcp.f32 %v673_v39 }
 0x69a   :  { %v667_v40 = vpop.xlane.xlu1 %666 }
 0x69b   :  { %2709 = vrcp.f32 %v667_v40 }
 0x69c   :  { %v670_v41 = vpop.xlane.xlu0 %669 }
 0x69d   :  { %2711 = vrcp.f32 %v670_v41 }
 0x69e   :  { %v683_v42 = vpop.permute.xlu1 %682 }
 0x69f   :  { %2435 = vmatprep.subr.bf16.mxu0 %v683_v42 }
 0x6a0   :  { %v751_v43 = vpop.permute.xlu0 %750  ;;  %2436 = vmatpush3.bf16.msra.mxu0 %v683_v42 }
 0x6a1   :  { %2610 = vmatprep.subr.msk.bf16.mxu0 %vm235_vm2, %v751_v43  ;;  %v762_v52 = vsel %vm235_vm2, %v751_v43, 0 }
 0x6a2   :  { %v749_v55 = vpop.permute.xlu1 %748 }
 0x6a3   :  { %v759_v56 = vsel %vm235_vm2, %v749_v55, 0 }
 0x6a4   :  { %v2708_v44 = vpop.eup %2707  ;;  %v745_v53 = vpop.permute.xlu0 %744 }
 0x6a5   :  { %v679_v47 = vmul.f32 %v2708_v44, %v2696_v11 }
 0x6a6   :  { %v747_v57 = vpop.permute.xlu1 %746 }
 0x6a7   :  { %v681_v51 = vpack.c.bf16 %v679_v47, %v679_v47 }
 0x6a8   :  { %v2710_v45 = vpop.eup %2709 }
 0x6a9   :  { %v677_v48 = vmul.f32 %v2710_v45, %v2698_v17 }
 0x6aa   :  { %v2712_v46 = vpop.eup %2711 }
 0x6ab   :  { %v678_v49 = vmul.f32 %v2712_v46, %v2702_v20 }
 0x6ad   :  { %v680_v50 = vpack.c.bf16 %v678_v49, %v677_v48 }
 0x6af   :  { %2437 = vmatprep.mubr.msk.bf16.mxu0 %vm302_vm11, %v680_v50 }
 0x6b0   :  { %2438 = vmatmul.mubr.msk.bf16.vlgmr.msra.gmra.mxu0 %vm302_vm11, %v681_v51 }
 0x6b1   :  { %2442 = vmatpush3.bf16.xpose.msra.mxu0 %v762_v52  ;;  %2445 = vmatprep.mubr.msk.bf16.mxu0 %vm235_vm2, %v745_v53  ;;  %v49_v52 = vld [vmem:[%s3566_s4 + $0x10] sm:$0xff]  ;;  %v50_v53 = vld [vmem:[%s3566_s4 + $0x18] sm:$0xff] }
 0x6b2   :  { %2611 = vmatprep.subr.msk.bf16.mxu0 %vm235_vm2, %v749_v55  ;;  %v3127_v55 = vpack.c.bf16 %v50_v53, %v49_v52 }
 0x6b9   :  { %2444 = vmatpush3.bf16.xpose.msra.mxu0 %v759_v56  ;;  %v47_v56 = vld [vmem:[%s3566_s4] sm:$0xff] }
 0x6c0   :  { %2446 = vmatmul.mubr.msk.bf16.vlgmr.msra.gmra.mxu0 %vm235_vm2, %v747_v57  ;;  %v48_v57 = vld [vmem:[%s3566_s4 + $0x8] sm:$0xff] }
 0x6da   :  { %v3087_v58 = vpop.f32.mrf.mxu0 }
 0x6dc   :  { %v3089_v60 = vpop.f32.mrf.mxu0 }
 0x6de   :  { %v2408_v61 = vpop.f32.mrf.mxu0 }
 0x6df   :  { %v3137_v61 = vpack.c.bf16 %v48_v57, %v47_v56 }
 0x6e0   :  { %v3091_v62 = vpop.f32.mrf.mxu0 }
 0x770   :  { %v2439_v63 = vpop.f32.mrf.mxu0 }
 0x772   :  { %v730_v0 = vpop.f32.mrf.mxu0 }
 0x774   :  { %v2440_v1 = vpop.f32.mrf.mxu0 }
 0x776   :  { %v733_v2 = vpop.f32.mrf.mxu0 }
 0x777   :  { %v2646_v4 = vpack.i.bf16 %v733_v2, %v730_v0 }
 0x780   :  { %v2447_v5 = vpop.f32.mrf.mxu0 }
 0x781   :  { %v814_v9 = vmul.f32 0.35355338, %v2447_v5 }
 0x782   :  { %v798_v6 = vpop.f32.mrf.mxu0 }
 0x783   :  { %v812_v10 = vmul.f32 0.35355338, %v798_v6  ;;  %v817_v17 = vsel %vm2983_vm13, %v814_v9, -1e+30 }
 0x784   :  { %v2448_v11 = vpop.f32.mrf.mxu0  ;;  %v824_v19 = vsel %vm309_vm15, %v817_v17, -inf }
 0x785   :  { %v815_v12 = vsel %vm100_vm7, %v812_v10, -1e+30 }
 0x786   :  { %v801_v13 = vpop.f32.mrf.mxu0  ;;  %v818_v15 = vsel %vm302_vm11, %v815_v12, -inf }
 0x787   :  { %v813_v16 = vmul.f32 0.35355338, %v801_v13  ;;  %819 = vmax.xlane.f32.xlu0 %v818_v15 }
 0x789   :  { %v816_v18 = vsel %vm2989_vm14, %v813_v16, -1e+30 }
 0x78a   :  { %v821_v20 = vsel %vm302_vm11, %v816_v18, -inf }
 0x78b   :  { %825 = vmax.xlane.f32.xlu0 %v824_v19  ;;  %822 = vmax.xlane.f32.xlu1 %v821_v20 }
 0x810   :  { %v820_v21 = vpop.xlane.xlu0 %819 }
 0x811   :  { %v827_v22 = vsub.f32 %v815_v12, %v820_v21 }
 0x813   :  { %v830_v24 = vmul.f32 1.442695, %v827_v22 }
 0x814   :  { %v826_v27 = vpop.xlane.xlu0 %825  ;;  %v823_v28 = vpop.xlane.xlu1 %822 }
 0x815   :  { %2713 = vpow2.f32 %v830_v24  ;;  %v829_v31 = vsub.f32 %v817_v17, %v826_v27  ;;  %v828_v34 = vsub.f32 %v816_v18, %v823_v28 }
 0x817   :  { %v834_v36 = vmul.f32 1.442695, %v829_v31  ;;  %v832_v37 = vmul.f32 1.442695, %v828_v34 }
 0x819   :  { %2715 = vpow2.f32 %v834_v36 }
 0x81a   :  { %2717 = vpow2.f32 %v832_v37  ;;  %v2250_v37 = vld [vmem:[%s3567_s5] ss:$0 sm:$0xff] }
 0x822   :  { %v2714_v38 = vpop.eup %2713 }
 0x823   :  { %v836_v39 = vsel %vm302_vm11, %v2714_v38, 0.0 }
 0x824   :  { %837 = vadd.xlane.f32.xlu0 %v836_v39 }
 0x826   :  { %v2716_v40 = vpop.eup %2715 }
 0x827   :  { %v2718_v41 = vpop.eup %2717  ;;  %v842_v42 = vsel %vm309_vm15, %v2716_v40, 0.0 }
 0x828   :  { %843 = vadd.xlane.f32.xlu1 %v842_v42  ;;  %v839_v43 = vsel %vm302_vm11, %v2718_v41, 0.0 }
 0x829   :  { %840 = vadd.xlane.f32.xlu0 %v839_v43 }
 0x839   :  { %853 = vrot.lane.b32.xlu1 %v2941_v59, %s2825_s12 }
 0x83d   :  { %2642 = vrot.lane.b32.xlu1 %v2641_v35, %s2826_s13 }
 0x83f   :  { %855 = vrot.lane.b32.xlu0 %v2937_v54, %s2825_s12 }
 0x841   :  { %922 = vrot.lane.b32.xlu1 %v3034_v23, %s2826_s13 }
 0x843   :  { %2647 = vrot.lane.b32.xlu0 %v2646_v4, %s2827_s14 }
 0x845   :  { %934 = vrot.lane.b32.xlu1 %v2439_v63, %s2827_s14 }
 0x8ad   :  { %v838_v44 = vpop.xlane.xlu0 %837 }
 0x8ae   :  { %2719 = vrcp.f32 %v838_v44 }
 0x8b1   :  { %v844_v59 = vpop.xlane.xlu1 %843 }
 0x8b2   :  { %v841_v45 = vpop.xlane.xlu0 %840  ;;  %2721 = vrcp.f32 %v844_v59 }
 0x8b3   :  { %2723 = vrcp.f32 %v841_v45 }
 0x8b5   :  { %v854_v54 = vpop.permute.xlu1 %853 }
 0x8b6   :  { %v856_v46 = vpop.permute.xlu0 %855 }
 0x8b7   :  { %v865_v25 = vsel %vm350_vm3, %v856_v46, 0  ;;  %2612 = vmatprep.subr.msk.bf16.mxu1 %vm350_vm3, %v856_v46 }
 0x8b8   :  { %2450 = vmatpush3.bf16.msra.mxu1 %v865_v25 }
 0x8b9   :  { %2451 = vmatprep.subr.bf16.mxu1 %v854_v54  ;;  %v2643_v5 = vpop.permute.xlu1 %2642 }
 0x8ba   :  { %v2648_v9 = vpop.permute.xlu0 %2647  ;;  %v2645_v10 = vunpack.i.h.bf16 %v2643_v5  ;;  %v2644_v11 = vunpack.i.l.bf16 %v2643_v5 }
 0x8bb   :  { %v2720_v23 = vpop.eup %2719  ;;  %v2650_v13 = vunpack.i.h.bf16 %v2648_v9  ;;  %v2649_v15 = vunpack.i.l.bf16 %v2648_v9  ;;  %v75_v9 = vld [vmem:[%s3569_s7 + $0x78] sm:$0xff] }
 0x8bc   :  { %2452 = vmatpush3.bf16.msra.mxu1 %v854_v54  ;;  %v848_v48 = vmul.f32 %v2720_v23, %v2714_v38  ;;  %v952_v16 = vsel %vm235_vm2, %v3091_v62, %v2645_v10  ;;  %v951_v17 = vsel %vm235_vm2, %v3089_v60, %v2644_v11  ;;  %v72_v10 = vld [vmem:[%s3569_s7 + $0x60] sm:$0xff] }
 0x8bd   :  { %2457 = vmatprep.subr.bf16.mxu1 %v3127_v55  ;;  %v923_v6 = vpop.permute.xlu1 %922  ;;  %v955_v28 = vsel %vm954_vm4, %v951_v17, %v2649_v15  ;;  %v956_v62 = vsel %vm954_vm4, %v952_v16, %v2650_v13  ;;  %v70_v15 = vld [vmem:[%s3569_s7 + $0x50] sm:$0xff]  ;;  %v71_v16 = vld [vmem:[%s3569_s7 + $0x58] sm:$0xff] }
 0x8be   :  { %v953_v19 = vsel %vm235_vm2, %v3087_v58, %v923_v6  ;;  %v74_v6 = vld [vmem:[%s3569_s7 + $0x70] sm:$0xff]  ;;  %v3235_v17 = vpack.c.bf16 %v71_v16, %v70_v15 }
 0x8bf   :  { %v2722_v33 = vpop.eup %2721  ;;  %v3219_v11 = vpack.c.bf16 %v75_v9, %v74_v6 }
 0x8c0   :  { %v2724_v35 = vpop.eup %2723  ;;  %v850_v47 = vmul.f32 %v2722_v33, %v2716_v40 }
 0x8c1   :  { %v849_v49 = vmul.f32 %v2724_v35, %v2718_v41  ;;  %v935_v12 = vpop.permute.xlu1 %934 }
 0x8c2   :  { %v852_v50 = vpack.c.bf16 %v850_v47, %v850_v47  ;;  %v957_v21 = vsel %vm954_vm4, %v953_v19, %v935_v12  ;;  %v73_v12 = vld [vmem:[%s3569_s7 + $0x68] sm:$0xff] }
 0x8c3   :  { %v851_v51 = vpack.c.bf16 %v849_v49, %v848_v48  ;;  %v3224_v13 = vpack.c.bf16 %v73_v12, %v72_v10  ;;  %v69_v19 = vld [vmem:[%s3569_s7 + $0x48] sm:$0xff] }
 0x8c5   :  { %2453 = vmatprep.mubr.msk.bf16.mxu1 %vm302_vm11, %v851_v51 }
 0x8c6   :  { %2454 = vmatmul.mubr.msk.bf16.vlgmr.msra.gmra.mxu1 %vm302_vm11, %v852_v50 }
 0x8c7   :  { %2458 = vmatpush3.bf16.msra.mxu1 %v3127_v55 }
 0x8c8   :  { %2459 = vmatprep.subr.bf16.mxu1 %v3137_v61 }
 0x8cb   :  { %2460 = vmatpush3.bf16.msra.mxu1 %v3137_v61 }
 0x8cc   :  { %2473 = vmatprep.subr.bf16.mxu1 %v3219_v11 }
 0x986   :  { %v2455_v63 = vpop.f32.mrf.mxu1 }
 0x987   :  { %946 = vrot.lane.b32.xlu1 %v2455_v63, %s2828_s21  ;;  %v56_v63 = vld [vmem:[%s3568_s6 + $0x10] sm:$0xff] }
 0x988   :  { %v901_v0 = vpop.f32.mrf.mxu1 }
 0x98a   :  { %v2456_v1 = vpop.f32.mrf.mxu1 }
 0x98b   :  { %v54_v1 = vld [vmem:[%s3568_s6] sm:$0xff] }
 0x98c   :  { %v904_v2 = vpop.f32.mrf.mxu1 }
 0x98d   :  { %v2651_v4 = vpack.i.bf16 %v904_v2, %v901_v0  ;;  %v57_v0 = vld [vmem:[%s3568_s6 + $0x18] sm:$0xff] }
 0x98e   :  { %v3198_v2 = vpack.c.bf16 %v57_v0, %v56_v63 }
 0x98f   :  { %2652 = vrot.lane.b32.xlu0 %v2651_v4, %s2828_s21  ;;  %v55_v4 = vld [vmem:[%s3568_s6 + $0x8] sm:$0xff] }
 0x990   :  { %v3203_v5 = vpack.c.bf16 %v55_v4, %v54_v1  ;;  %2465 = vmatprep.subr.bf16.mxu0 %v3198_v2 }
 0x991   :  { %2466 = vmatpush3.bf16.msra.mxu0 %v3198_v2 }
 0x992   :  { %2467 = vmatprep.subr.bf16.mxu0 %v3203_v5 }
 0x995   :  { %2468 = vmatpush3.bf16.msra.mxu0 %v3203_v5 }
 0x996   :  { %2493 = vmatprep.subr.bf16.mxu0 %v2921_v30 }
 0x9f9   :  { %v947_v18 = vpop.permute.xlu1 %946 }
 0x9fa   :  { %v961_v27 = vsel %vm958_vm5, %v957_v21, %v947_v18  ;;  %v68_v18 = vld [vmem:[%s3569_s7 + $0x40] sm:$0xff]  ;;  %v66_v21 = vld [vmem:[%s3569_s7 + $0x30] sm:$0xff] }
 0x9fb   :  { %v963_v36 = vpack.c.bf16 %v961_v27, %v961_v27 }
 0xa01   :  { %v2653_v20 = vpop.permute.xlu0 %2652 }
 0xa02   :  { %v2655_v22 = vunpack.i.h.bf16 %v2653_v20  ;;  %v2654_v24 = vunpack.i.l.bf16 %v2653_v20  ;;  %v3245_v20 = vpack.c.bf16 %v69_v19, %v68_v18 }
 0xa04   :  { %v959_v31 = vsel %vm958_vm5, %v955_v28, %v2654_v24  ;;  %v960_v60 = vsel %vm958_vm5, %v956_v62, %v2655_v22  ;;  %v67_v22 = vld [vmem:[%s3569_s7 + $0x38] sm:$0xff] }
 0xa05   :  { %v962_v34 = vpack.c.bf16 %v960_v60, %v959_v31  ;;  %v3255_v24 = vpack.c.bf16 %v67_v22, %v66_v21 }
 0xa07   :  { %2461 = vmatprep.mubr.msk.bf16.mxu1 %vm123_vm0, %v962_v34 }
 0xa08   :  { %2462 = vmatmul.mubr.msk.bf16.vlgmr.msra.gmra.mxu1 %vm123_vm0, %v963_v36 }
 0xa09   :  { %2474 = vmatpush3.bf16.msra.mxu1 %v3219_v11 }
 0xa0a   :  { %2475 = vmatprep.subr.bf16.mxu1 %v3224_v13 }
 0xa0d   :  { %2476 = vmatpush3.bf16.msra.mxu1 %v3224_v13 }
 0xa0e   :  { %2477 = vmatprep.subr.bf16.mxu1 %v3235_v17 }
 0xa11   :  { %2478 = vmatpush3.bf16.msra.mxu1 %v3235_v17 }
 0xa12   :  { %2479 = vmatprep.subr.bf16.mxu1 %v3245_v20 }
 0xa15   :  { %2480 = vmatpush3.bf16.msra.mxu1 %v3245_v20 }
 0xa16   :  { %2481 = vmatprep.subr.bf16.mxu1 %v3255_v24 }
 0xa19   :  { %2482 = vmatpush3.bf16.msra.mxu1 %v3255_v24 }
 0xac8   :  { %v2463_v58 = vpop.f32.mrf.mxu1 }
 0xac9   :  { %v1019_v39 = vadd.f32 %v2463_v58, %v2250_v37 }
 0xaca   :  { %v1010_v38 = vpop.f32.mrf.mxu1 }
 0xacb   :  { %v1011_v40 = vadd.f32 %v2250_v37, %v1010_v38  ;;  %v3164_v44 = vadd.f32 %v1019_v39, %v2896_v7 }
 0xacc   :  { %v2464_v41 = vpop.f32.mrf.mxu1 }
 0xacd   :  { %v3161_v42 = vadd.f32 %v1011_v40, %v2885_v3  ;;  %v1033_v54 = vsel %vm130_vm1, %v3164_v44, 0.0 }
 0xace   :  { %v1013_v43 = vpop.f32.mrf.mxu1 }
 0xacf   :  { %v1014_v59 = vadd.f32 %v2250_v37, %v1013_v43  ;;  %v1027_v45 = vsel %vm123_vm0, %v3161_v42, 0.0 }
 0xad0   :  { %1028 = vadd.xlane.f32.xlu0 %v1027_v45 }
 0xad1   :  { %v3169_v46 = vadd.f32 %v1014_v59, %v2898_v8 }
 0xad3   :  { %v1030_v25 = vsel %vm123_vm0, %v3169_v46, 0.0 }
 0xad4   :  { %1031 = vadd.xlane.f32.xlu1 %v1030_v25  ;;  %1034 = vadd.xlane.f32.xlu0 %v1033_v54  ;;  %v64_v54 = vld [vmem:[%s3569_s7 + $0x20] sm:$0xff] }
 0xb59   :  { %v1029_v3 = vpop.xlane.xlu0 %1028 }
 0xb5a   :  { %v1036_v23 = vmul.f32 0.03125, %v1029_v3  ;;  %v65_v3 = vld [vmem:[%s3569_s7 + $0x28] sm:$0xff] }
 0xb5c   :  { %v3176_v7 = vsub.f32 %v3161_v42, %v1036_v23  ;;  %v3273_v23 = vpack.c.bf16 %v65_v3, %v64_v54 }
 0xb5d   :  { %v1032_v33 = vpop.xlane.xlu1 %1031  ;;  %v1035_v35 = vpop.xlane.xlu0 %1034 }
 0xb5e   :  { %v1037_v47 = vmul.f32 0.03125, %v1032_v33  ;;  %v1038_v48 = vmul.f32 0.03125, %v1035_v35  ;;  %v1042_v8 = vmul.f32 %v3176_v7, %v3176_v7  ;;  %2483 = vmatprep.subr.bf16.mxu1 %v3273_v23  ;;  %v60_v33 = vld [vmem:[%s3569_s7] sm:$0xff]  ;;  %v61_v35 = vld [vmem:[%s3569_s7 + $0x8] sm:$0xff] }
 0xb5f   :  { %2484 = vmatpush3.bf16.msra.mxu1 %v3273_v23 }
 0xb60   :  { %v3181_v49 = vsub.f32 %v3169_v46, %v1037_v47  ;;  %v1041_v50 = vsub.f32 %v3164_v44, %v1038_v48  ;;  %v1045_v51 = vsel %vm123_vm0, %v1042_v8, 0.0  ;;  %v3293_v47 = vpack.c.bf16 %v61_v35, %v60_v33 }
 0xb61   :  { %1046 = vadd.xlane.f32.xlu0 %v1045_v51 }
 0xb62   :  { %v1043_v52 = vmul.f32 %v3181_v49, %v3181_v49  ;;  %v1044_v53 = vmul.f32 %v1041_v50, %v1041_v50 }
 0xb64   :  { %v1048_v56 = vsel %vm123_vm0, %v1043_v52, 0.0  ;;  %v1051_v57 = vsel %vm130_vm1, %v1044_v53, 0.0 }
 0xb65   :  { %1049 = vadd.xlane.f32.xlu0 %v1048_v56  ;;  %1052 = vadd.xlane.f32.xlu1 %v1051_v57 }
 0xbea   :  { %v1047_v27 = vpop.xlane.xlu0 %1046 }
 0xbeb   :  { %v1054_v28 = vmul.f32 0.03125, %v1047_v27 }
 0xbed   :  { %v1057_v62 = vadd.f32 1e-05, %v1054_v28 }
 0xbee   :  { %v1053_v31 = vpop.xlane.xlu1 %1052  ;;  %v1050_v60 = vpop.xlane.xlu0 %1049 }
 0xbef   :  { %v1056_v34 = vmul.f32 0.03125, %v1053_v31  ;;  %v1055_v36 = vmul.f32 0.03125, %v1050_v60  ;;  %2725 = vrsqrt.f32 %v1057_v62 }
 0xbf1   :  { %v1059_v58 = vadd.f32 1e-05, %v1056_v34  ;;  %v1058_v37 = vadd.f32 1e-05, %v1055_v36 }
 0xbf3   :  { %2727 = vrsqrt.f32 %v1059_v58 }
 0xbf4   :  { %2729 = vrsqrt.f32 %v1058_v37 }
 0xbfc   :  { %v2726_v38 = vpop.eup %2725 }
 0xbfd   :  { %v1063_v43 = vmul.f32 %v2726_v38, %v3176_v7 }
 0xc00   :  { %v2728_v39 = vpop.eup %2727 }
 0xc01   :  { %v2730_v40 = vpop.eup %2729  ;;  %v1065_v41 = vmul.f32 %v2728_v39, %v1041_v50 }
 0xc02   :  { %v1064_v59 = vmul.f32 %v2730_v40, %v3181_v49 }
 0xc03   :  { %v1067_v45 = vpack.c.bf16 %v1065_v41, %v1065_v41 }
 0xc04   :  { %v1066_v25 = vpack.c.bf16 %v1064_v59, %v1063_v43 }
 0xc06   :  { %2469 = vmatprep.mubr.msk.bf16.mxu0 %vm123_vm0, %v1066_v25 }
 0xc07   :  { %2470 = vmatmul.mubr.msk.bf16.vlgmr.msra.gmra.mxu0 %vm123_vm0, %v1067_v45 }
 0xc08   :  { %2494 = vmatpush3.bf16.msra.mxu0 %v2921_v30  ;;  %v62_v30 = vld [vmem:[%s3569_s7 + $0x10] sm:$0xff] }
 0xc09   :  { %2495 = vmatprep.subr.bf16.mxu0 %v2926_v32 }
 0xc0c   :  { %2496 = vmatpush3.bf16.msra.mxu0 %v2926_v32  ;;  %v63_v32 = vld [vmem:[%s3569_s7 + $0x18] sm:$0xff] }
 0xc0d   :  { %v3283_v7 = vpack.c.bf16 %v63_v32, %v62_v30 }
 0xc0f   :  { %2485 = vmatprep.subr.bf16.mxu1 %v3283_v7 }
 0xc10   :  { %2486 = vmatpush3.bf16.msra.mxu1 %v3283_v7 }
 0xc11   :  { %2487 = vmatprep.subr.bf16.mxu1 %v3293_v47 }
 0xc14   :  { %2488 = vmatpush3.bf16.msra.mxu1 %v3293_v47 }
 0xcc7   :  { %v2471_v48 = vpop.f32.mrf.mxu0 }
 0xcc8   :  { %v1124_v50 = vmax.f32 %v2471_v48, 0.0 }
 0xcc9   :  { %v1108_v8 = vpop.f32.mrf.mxu0 }
 0xcca   :  { %v1122_v52 = vmax.f32 %v1108_v8, 0.0  ;;  %v1126_v57 = vpack.c.bf16 %v1124_v50, %v1124_v50  ;;  %v2791_v50 = vld [vmem:[%s3565_s3] ss:$0 sm:$0xff] }
 0xccb   :  { %v2472_v49 = vpop.f32.mrf.mxu0 }
 0xccd   :  { %v1111_v51 = vpop.f32.mrf.mxu0 }
 0xcce   :  { %v1123_v53 = vmax.f32 %v1111_v51, 0.0 }
 0xcd0   :  { %v1125_v56 = vpack.c.bf16 %v1123_v53, %v1122_v52 }
 0xcd2   :  { %2489 = vmatprep.mubr.bf16.mxu1 %v1125_v56 }
 0xcd3   :  { %2490 = vmatmul.mubr.bf16.vlgmr.msra.gmra.mxu1 %v1126_v57 }
 0xd93   :  { %v2491_v63 = vpop.f32.mrf.mxu1 }
 0xd94   :  { %v3301_v6 = vadd.f32 %v2491_v63, %v3164_v44 }
 0xd95   :  { %v1161_v0 = vpop.f32.mrf.mxu1 }
 0xd96   :  { %v3298_v1 = vadd.f32 %v1161_v0, %v3161_v42  ;;  %v1184_v15 = vsel %vm130_vm1, %v3301_v6, 0.0 }
 0xd97   :  { %v2492_v4 = vpop.f32.mrf.mxu1 }
 0xd98   :  { %v1178_v9 = vsel %vm123_vm0, %v3298_v1, 0.0 }
 0xd99   :  { %1179 = vadd.xlane.f32.xlu0 %v1178_v9  ;;  %v1164_v10 = vpop.f32.mrf.mxu1 }
 0xd9a   :  { %v3306_v12 = vadd.f32 %v1164_v10, %v3169_v46 }
 0xd9c   :  { %v1181_v16 = vsel %vm123_vm0, %v3306_v12, 0.0 }
 0xd9d   :  { %1185 = vadd.xlane.f32.xlu0 %v1184_v15  ;;  %1182 = vadd.xlane.f32.xlu1 %v1181_v16 }
 0xe22   :  { %v1180_v42 = vpop.xlane.xlu0 %1179 }
 0xe23   :  { %v1187_v18 = vmul.f32 0.03125, %v1180_v42 }
 0xe25   :  { %v1190_v44 = vsub.f32 %v3298_v1, %v1187_v18 }
 0xe26   :  { %v1186_v19 = vpop.xlane.xlu0 %1185  ;;  %v1183_v21 = vpop.xlane.xlu1 %1182 }
 0xe27   :  { %v1189_v22 = vmul.f32 0.03125, %v1186_v19  ;;  %v1188_v27 = vmul.f32 0.03125, %v1183_v21  ;;  %v1193_v28 = vmul.f32 %v1190_v44, %v1190_v44 }
 0xe29   :  { %v1192_v46 = vsub.f32 %v3301_v6, %v1189_v22  ;;  %v1191_v62 = vsub.f32 %v3306_v12, %v1188_v27  ;;  %v1196_v31 = vsel %vm123_vm0, %v1193_v28, 0.0 }
 0xe2a   :  { %1197 = vadd.xlane.f32.xlu1 %v1196_v31 }
 0xe2b   :  { %v1195_v60 = vmul.f32 %v1192_v46, %v1192_v46  ;;  %v1194_v34 = vmul.f32 %v1191_v62, %v1191_v62 }
 0xe2d   :  { %v1202_v36 = vsel %vm130_vm1, %v1195_v60, 0.0  ;;  %v1199_v58 = vsel %vm123_vm0, %v1194_v34, 0.0 }
 0xe2e   :  { %1203 = vadd.xlane.f32.xlu1 %v1202_v36  ;;  %1200 = vadd.xlane.f32.xlu0 %v1199_v58 }
 0xeb3   :  { %v1198_v37 = vpop.xlane.xlu1 %1197 }
 0xeb4   :  { %v1205_v38 = vmul.f32 0.03125, %v1198_v37 }
 0xeb6   :  { %v1208_v39 = vadd.f32 1e-05, %v1205_v38 }
 0xeb7   :  { %v1201_v40 = vpop.xlane.xlu0 %1200  ;;  %v1204_v41 = vpop.xlane.xlu1 %1203 }
 0xeb8   :  { %v1206_v43 = vmul.f32 0.03125, %v1201_v40  ;;  %v1207_v59 = vmul.f32 0.03125, %v1204_v41  ;;  %2731 = vrsqrt.f32 %v1208_v39 }
 0xeba   :  { %v1209_v45 = vadd.f32 1e-05, %v1206_v43  ;;  %v1210_v25 = vadd.f32 1e-05, %v1207_v59 }
 0xebc   :  { %2733 = vrsqrt.f32 %v1209_v45 }
 0xebd   :  { %2735 = vrsqrt.f32 %v1210_v25 }
 0xec5   :  { %v2732_v54 = vpop.eup %2731 }
 0xec6   :  { %v1214_v32 = vmul.f32 %v2732_v54, %v1190_v44 }
 0xec9   :  { %v2734_v3 = vpop.eup %2733 }
 0xeca   :  { %v2736_v30 = vpop.eup %2735  ;;  %v1215_v33 = vmul.f32 %v2734_v3, %v1191_v62 }
 0xecb   :  { %v1216_v35 = vmul.f32 %v2736_v30, %v1192_v46 }
 0xecc   :  { %v1217_v48 = vpack.c.bf16 %v1215_v33, %v1214_v32 }
 0xecd   :  { %v1218_v8 = vpack.c.bf16 %v1216_v35, %v1216_v35 }
 0xece   :  { %2497 = vmatprep.mubr.msk.bf16.mxu0 %vm123_vm0, %v1217_v48 }
 0xecf   :  { %2498 = vmatmul.mubr.msk.bf16.vlgmr.msra.gmra.mxu0 %vm123_vm0, %v1218_v8 }
 0xf8f   :  { %v2499_v49 = vpop.f32.mrf.mxu0 }
 0xf90   :  { %v1268_v51 = vadd.f32 %v2791_v50, %v2499_v49 }
 0xf91   :  { %v1259_v52 = vpop.f32.mrf.mxu0 }
 0xf92   :  { %v3323_v53 = vpack.c.bf16 %v1268_v51, %v1268_v51  ;;  %v1260_v63 = vadd.f32 %v2791_v50, %v1259_v52 }
 0xf93   :  { %v2500_v56 = vpop.f32.mrf.mxu0 }
 0xf94   :  { %1279 = vrot.lane.b32.xlu0 %v3323_v53, %s2815_s24 }
 0xf95   :  { %v1262_v57 = vpop.f32.mrf.mxu0 }
 0xf96   :  { %v1263_v0 = vadd.f32 %v2791_v50, %v1262_v57 }
 0xf98   :  { %v3327_v4 = vpack.c.bf16 %v1263_v0, %v1260_v63 }
 0xf9a   :  { %1444 = vrot.lane.b32.xlu0 %v3327_v4, %s2816_s25  ;;  %1277 = vrot.lane.b32.xlu1 %v3327_v4, %s2815_s24 }
 0xf9b   :  { %2505 = vmatprep.mubr.msk.bf16.mxu0 %vm235_vm2, %v3327_v4 }
 0xf9e   :  { %1450 = vrot.lane.b32.xlu1 %v3323_v53, %s2817_s26 }
 0xfa2   :  { %1448 = vrot.lane.b32.xlu1 %v3327_v4, %s2817_s26 }
 0xfa6   :  { %1446 = vrot.lane.b32.xlu1 %v3323_v53, %s2816_s25 }
0x1006   :  { %v1280_v9 = vpop.permute.xlu0 %1279 }
0x1007   :  { %v1291_v10 = vsel %vm235_vm2, %v1280_v9, 0  ;;  %2613 = vmatprep.subr.msk.bf16.mxu0 %vm235_vm2, %v1280_v9 }
0x1008   :  { %2502 = vmatpush3.bf16.xpose.msra.mxu0 %v1291_v10 }
0x100c   :  { %v1445_v15 = vpop.permute.xlu0 %1444  ;;  %v1278_v16 = vpop.permute.xlu1 %1277 }
0x100d   :  { %2614 = vmatprep.subr.msk.bf16.mxu0 %vm235_vm2, %v1278_v16  ;;  %2521 = vmatprep.mubr.msk.bf16.mxu1 %vm235_vm2, %v1445_v15  ;;  %v1288_v42 = vsel %vm235_vm2, %v1278_v16, 0 }
0x1010   :  { %2504 = vmatpush3.bf16.xpose.msra.mxu0 %v1288_v42  ;;  %v1451_v18 = vpop.permute.xlu1 %1450 }
0x1011   :  { %v1462_v44 = vsel %vm235_vm2, %v1451_v18, 0  ;;  %2616 = vmatprep.subr.msk.bf16.mxu1 %vm235_vm2, %v1451_v18 }
0x1012   :  { %2518 = vmatpush3.bf16.xpose.msra.mxu1 %v1462_v44 }
0x1014   :  { %v1449_v19 = vpop.permute.xlu1 %1448 }
0x1015   :  { %2617 = vmatprep.subr.msk.bf16.mxu1 %vm235_vm2, %v1449_v19  ;;  %v1459_v21 = vsel %vm235_vm2, %v1449_v19, 0 }
0x1017   :  { %2506 = vmatmul.mubr.msk.bf16.vlgmr.msra.gmra.mxu0 %vm235_vm2, %v3323_v53 }
0x1018   :  { %v1447_v22 = vpop.permute.xlu1 %1446 }
0x101a   :  { %2520 = vmatpush3.bf16.xpose.msra.mxu1 %v1459_v21 }
0x1021   :  { %2522 = vmatmul.mubr.msk.bf16.vlgmr.msra.gmra.mxu1 %vm235_vm2, %v1447_v22 }
0x10d7   :  { %v2507_v27 = vpop.f32.mrf.mxu0 }
0x10d8   :  { %v1343_v46 = vmul.f32 0.35355338, %v2507_v27 }
0x10d9   :  { %v1327_v28 = vpop.f32.mrf.mxu0 }
0x10da   :  { %v1341_v62 = vmul.f32 0.35355338, %v1327_v28  ;;  %v1346_v37 = vsel %vm2983_vm13, %v1343_v46, -1e+30 }
0x10db   :  { %v2508_v31 = vpop.f32.mrf.mxu0  ;;  %v1353_v40 = vsel %vm309_vm15, %v1346_v37, -inf }
0x10dc   :  { %v1344_v60 = vsel %vm100_vm7, %v1341_v62, -1e+30 }
0x10dd   :  { %v1330_v34 = vpop.f32.mrf.mxu0  ;;  %v1347_v36 = vsel %vm302_vm11, %v1344_v60, -inf }
0x10de   :  { %v1342_v58 = vmul.f32 0.35355338, %v1330_v34  ;;  %1348 = vmax.xlane.f32.xlu0 %v1347_v36 }
0x10e0   :  { %v1345_v38 = vsel %vm2989_vm14, %v1342_v58, -1e+30 }
0x10e1   :  { %v2523_v39 = vpop.f32.mrf.mxu1  ;;  %v1350_v41 = vsel %vm302_vm11, %v1345_v38, -inf }
0x10e2   :  { %v1514_v43 = vmul.f32 0.35355338, %v2523_v39  ;;  %1354 = vmax.xlane.f32.xlu0 %v1353_v40  ;;  %1351 = vmax.xlane.f32.xlu1 %v1350_v41 }
0x10e3   :  { %v1498_v59 = vpop.f32.mrf.mxu1 }
0x10e4   :  { %v1512_v45 = vmul.f32 0.35355338, %v1498_v59  ;;  %v1517_v25 = vsel %vm2983_vm13, %v1514_v43, -1e+30 }
0x10e5   :  { %v2524_v54 = vpop.f32.mrf.mxu1  ;;  %v1524_v3 = vsel %vm309_vm15, %v1517_v25, -inf }
0x10e6   :  { %1525 = vmax.xlane.f32.xlu1 %v1524_v3  ;;  %v1515_v30 = vsel %vm100_vm7, %v1512_v45, -1e+30 }
0x10e7   :  { %v1501_v32 = vpop.f32.mrf.mxu1  ;;  %v1518_v33 = vsel %vm302_vm11, %v1515_v30, -inf }
0x10e8   :  { %v1513_v35 = vmul.f32 0.35355338, %v1501_v32  ;;  %1519 = vmax.xlane.f32.xlu0 %v1518_v33 }
0x10ea   :  { %v1516_v48 = vsel %vm2989_vm14, %v1513_v35, -1e+30 }
0x10eb   :  { %v1521_v8 = vsel %vm302_vm11, %v1516_v48, -inf }
0x10ec   :  { %1522 = vmax.xlane.f32.xlu0 %v1521_v8 }
0x1167   :  { %v1349_v49 = vpop.xlane.xlu0 %1348 }
0x1168   :  { %v1356_v50 = vsub.f32 %v1344_v60, %v1349_v49 }
0x116a   :  { %v1359_v57 = vmul.f32 1.442695, %v1356_v50 }
0x116b   :  { %v1355_v51 = vpop.xlane.xlu0 %1354  ;;  %v1352_v52 = vpop.xlane.xlu1 %1351 }
0x116c   :  { %v1358_v56 = vsub.f32 %v1346_v37, %v1355_v51  ;;  %v1357_v62 = vsub.f32 %v1345_v38, %v1352_v52 }
0x116e   :  { %v1363_v63 = vmul.f32 1.442695, %v1358_v56  ;;  %v1361_v60 = vmul.f32 1.442695, %v1357_v62 }
0x116f   :  { %v1526_v0 = vpop.xlane.xlu1 %1525 }
0x1170   :  { %2737 = vpow2.f32 %v1363_v63  ;;  %v1529_v9 = vsub.f32 %v1517_v25, %v1526_v0 }
0x1171   :  { %2739 = vpow2.f32 %v1359_v57  ;;  %v1520_v21 = vpop.xlane.xlu0 %1519 }
0x1172   :  { %v1534_v10 = vmul.f32 1.442695, %v1529_v9  ;;  %v1527_v28 = vsub.f32 %v1515_v30, %v1520_v21 }
0x1174   :  { %2741 = vpow2.f32 %v1534_v10  ;;  %v1530_v31 = vmul.f32 1.442695, %v1527_v28 }
0x1175   :  { %v1523_v22 = vpop.xlane.xlu0 %1522 }
0x1176   :  { %v1528_v27 = vsub.f32 %v1516_v48, %v1523_v22 }
0x1178   :  { %v1532_v46 = vmul.f32 1.442695, %v1528_v27 }
0x117a   :  { %2743 = vpow2.f32 %v1532_v46 }
0x117b   :  { %2745 = vpow2.f32 %v1530_v31 }
0x117c   :  { %2747 = vpow2.f32 %v1361_v60 }
0x117d   :  { %v3371_v15 = vpop.eup %2737 }
0x117e   :  { %v1371_v16 = vsel %vm309_vm15, %v3371_v15, 0.0  ;;  %v2740_v42 = vpop.eup %2739 }
0x117f   :  { %1372 = vadd.xlane.f32.xlu0 %v1371_v16  ;;  %v1365_v44 = vsel %vm302_vm11, %v2740_v42, 0.0 }
0x1181   :  { %v3375_v18 = vpop.eup %2741 }
0x1182   :  { %v1542_v19 = vsel %vm309_vm15, %v3375_v18, 0.0 }
0x1183   :  { %1366 = vadd.xlane.f32.xlu0 %v1365_v44  ;;  %1543 = vadd.xlane.f32.xlu1 %v1542_v19 }
0x1187   :  { %v2744_v34 = vpop.eup %2743 }
0x1188   :  { %v1539_v36 = vsel %vm302_vm11, %v2744_v34, 0.0  ;;  %v2746_v58 = vpop.eup %2745 }
0x1189   :  { %v1536_v37 = vsel %vm302_vm11, %v2746_v58, 0.0  ;;  %v2748_v39 = vpop.eup %2747 }
0x118a   :  { %v1368_v40 = vsel %vm302_vm11, %v2748_v39, 0.0 }
0x1194   :  { %1382 = vrot.lane.b32.xlu1 %v3327_v4, %s2821_s30 }
0x1198   :  { %1555 = vrot.lane.b32.xlu1 %v3323_v53, %s2818_s27 }
0x1199   :  { %1384 = vrot.lane.b32.xlu0 %v3323_v53, %s2821_s30 }
0x11b8   :  { %1540 = vadd.xlane.f32.xlu0 %v1539_v36 }
0x11bc   :  { %1537 = vadd.xlane.f32.xlu1 %v1536_v37 }
0x11c0   :  { %1369 = vadd.xlane.f32.xlu1 %v1368_v40 }
0x11ce   :  { %1621 = vrot.lane.b32.xlu0 %v3323_v53, %s2819_s28 }
0x11d1   :  { %1553 = vrot.lane.b32.xlu1 %v3327_v4, %s2818_s27 }
0x11d2   :  { %1615 = vrot.lane.b32.xlu0 %v3327_v4, %s2820_s29 }
0x11d5   :  { %1619 = vrot.lane.b32.xlu1 %v3327_v4, %s2819_s28 }
0x11d9   :  { %1617 = vrot.lane.b32.xlu1 %v3323_v53, %s2820_s29 }
0x1208   :  { %v1373_v38 = vpop.xlane.xlu0 %1372 }
0x1209   :  { %2749 = vrcp.f32 %v1373_v38 }
0x120c   :  { %v1367_v41 = vpop.xlane.xlu0 %1366  ;;  %v1544_v43 = vpop.xlane.xlu1 %1543 }
0x120d   :  { %2751 = vrcp.f32 %v1367_v41 }
0x1210   :  { %v1385_v59 = vpop.permute.xlu0 %1384  ;;  %v1383_v45 = vpop.permute.xlu1 %1382 }
0x1211   :  { %v1394_v25 = vsel %vm350_vm3, %v1385_v59, 0  ;;  %2615 = vmatprep.subr.msk.bf16.mxu0 %vm350_vm3, %v1385_v59 }
0x1212   :  { %2510 = vmatpush3.bf16.msra.mxu0 %v1394_v25 }
0x1213   :  { %2511 = vmatprep.subr.bf16.mxu0 %v1383_v45 }
0x1214   :  { %v1556_v54 = vpop.permute.xlu1 %1555 }
0x1215   :  { %v1565_v16 = vsel %vm350_vm3, %v1556_v54, 0 }
0x1216   :  { %2512 = vmatpush3.bf16.msra.mxu0 %v1383_v45  ;;  %v2750_v33 = vpop.eup %2749 }
0x1217   :  { %2618 = vmatprep.subr.msk.bf16.mxu0 %vm350_vm3, %v1556_v54  ;;  %v1379_v50 = vmul.f32 %v2750_v33, %v3371_v15 }
0x1219   :  { %v1381_v0 = vpack.c.bf16 %v1379_v50, %v1379_v50 }
0x121a   :  { %v2752_v35 = vpop.eup %2751 }
0x121b   :  { %v1377_v51 = vmul.f32 %v2752_v35, %v2740_v42 }
0x1241   :  { %v1541_v30 = vpop.xlane.xlu0 %1540 }
0x1245   :  { %v1538_v3 = vpop.xlane.xlu1 %1537  ;;  %v1622_v19 = vpop.permute.xlu0 %1621 }
0x1246   :  { %2753 = vrcp.f32 %v1538_v3  ;;  %v1633_v21 = vsel %vm235_vm2, %v1622_v19, 0 }
0x1247   :  { %2755 = vrcp.f32 %v1541_v30 }
0x1249   :  { %v1370_v32 = vpop.xlane.xlu1 %1369  ;;  %v1616_v22 = vpop.permute.xlu0 %1615 }
0x124a   :  { %2757 = vrcp.f32 %v1370_v32 }
0x124b   :  { %2759 = vrcp.f32 %v1544_v43 }
0x124d   :  { %v1554_v44 = vpop.permute.xlu1 %1553 }
0x1251   :  { %v1620_v27 = vpop.permute.xlu1 %1619 }
0x1252   :  { %v1630_v28 = vsel %vm235_vm2, %v1620_v27, 0 }
0x1253   :  { %v2754_v48 = vpop.eup %2753 }
0x1254   :  { %v2756_v8 = vpop.eup %2755  ;;  %v1548_v56 = vmul.f32 %v2754_v48, %v2746_v58 }
0x1255   :  { %v1549_v63 = vmul.f32 %v2756_v8, %v2744_v34  ;;  %v1618_v46 = vpop.permute.xlu1 %1617 }
0x1257   :  { %v2758_v49 = vpop.eup %2757  ;;  %v1551_v10 = vpack.c.bf16 %v1549_v63, %v1548_v56 }
0x1258   :  { %v1378_v52 = vmul.f32 %v2758_v49, %v2748_v39  ;;  %v2760_v9 = vpop.eup %2759 }
0x1259   :  { %v1550_v15 = vmul.f32 %v2760_v9, %v3375_v18 }
0x125a   :  { %v1380_v57 = vpack.c.bf16 %v1378_v52, %v1377_v51 }
0x125b   :  { %v1552_v42 = vpack.c.bf16 %v1550_v15, %v1550_v15 }
0x125c   :  { %2513 = vmatprep.mubr.msk.bf16.mxu0 %vm302_vm11, %v1380_v57 }
0x125d   :  { %2514 = vmatmul.mubr.msk.bf16.vlgmr.msra.gmra.mxu0 %vm302_vm11, %v1381_v0 }
0x125e   :  { %2526 = vmatpush3.bf16.msra.mxu0 %v1565_v16  ;;  %2529 = vmatprep.mubr.msk.bf16.mxu0 %vm302_vm11, %v1551_v10 }
0x125f   :  { %2527 = vmatprep.subr.bf16.mxu0 %v1554_v44 }
0x1262   :  { %2528 = vmatpush3.bf16.msra.mxu0 %v1554_v44 }
0x1263   :  { %2619 = vmatprep.subr.msk.bf16.mxu0 %vm235_vm2, %v1622_v19 }
0x1265   :  { %2530 = vmatmul.mubr.msk.bf16.vlgmr.msra.gmra.mxu0 %vm302_vm11, %v1552_v42 }
0x1266   :  { %2534 = vmatpush3.bf16.xpose.msra.mxu0 %v1633_v21  ;;  %2537 = vmatprep.mubr.msk.bf16.mxu0 %vm235_vm2, %v1616_v22 }
0x1267   :  { %2620 = vmatprep.subr.msk.bf16.mxu0 %vm235_vm2, %v1620_v27 }
0x126e   :  { %2536 = vmatpush3.bf16.xpose.msra.mxu0 %v1630_v28 }
0x1275   :  { %2538 = vmatmul.mubr.msk.bf16.vlgmr.msra.gmra.mxu0 %vm235_vm2, %v1618_v46 }
0x131d   :  { %v3415_v18 = vpop.f32.mrf.mxu0 }
0x131f   :  { %v3417_v62 = vpop.f32.mrf.mxu0 }
0x1321   :  { %v2516_v31 = vpop.f32.mrf.mxu0 }
0x1323   :  { %v3419_v60 = vpop.f32.mrf.mxu0 }
0x1325   :  { %v3421_v34 = vpop.f32.mrf.mxu0 }
0x1327   :  { %v3423_v36 = vpop.f32.mrf.mxu0 }
0x1329   :  { %v2532_v58 = vpop.f32.mrf.mxu0 }
0x132b   :  { %v3425_v37 = vpop.f32.mrf.mxu0 }
0x132c   :  { %v2656_v39 = vpack.i.bf16 %v3425_v37, %v3423_v36 }
0x1335   :  { %v2539_v40 = vpop.f32.mrf.mxu0 }
0x1336   :  { %v1685_v41 = vmul.f32 0.35355338, %v2539_v40 }
0x1337   :  { %v1669_v38 = vpop.f32.mrf.mxu0 }
0x1338   :  { %v1683_v43 = vmul.f32 0.35355338, %v1669_v38  ;;  %v1688_v30 = vsel %vm2983_vm13, %v1685_v41, -1e+30 }
0x1339   :  { %v2540_v59 = vpop.f32.mrf.mxu0  ;;  %v1695_v33 = vsel %vm309_vm15, %v1688_v30, -inf }
0x133a   :  { %v1686_v45 = vsel %vm100_vm7, %v1683_v43, -1e+30 }
0x133b   :  { %v1672_v25 = vpop.f32.mrf.mxu0  ;;  %v1689_v54 = vsel %vm302_vm11, %v1686_v45, -inf }
0x133c   :  { %v1684_v3 = vmul.f32 0.35355338, %v1672_v25  ;;  %1690 = vmax.xlane.f32.xlu0 %v1689_v54 }
0x133e   :  { %v1687_v32 = vsel %vm2989_vm14, %v1684_v3, -1e+30 }
0x133f   :  { %v1692_v35 = vsel %vm302_vm11, %v1687_v32, -inf }
0x1340   :  { %1696 = vmax.xlane.f32.xlu0 %v1695_v33  ;;  %1693 = vmax.xlane.f32.xlu1 %v1692_v35 }
0x13c5   :  { %v1691_v48 = vpop.xlane.xlu0 %1690 }
0x13c6   :  { %v1698_v8 = vsub.f32 %v1686_v45, %v1691_v48 }
0x13c8   :  { %v1701_v49 = vmul.f32 1.442695, %v1698_v8 }
0x13c9   :  { %v1697_v50 = vpop.xlane.xlu0 %1696  ;;  %v1694_v51 = vpop.xlane.xlu1 %1693 }
0x13ca   :  { %2761 = vpow2.f32 %v1701_v49  ;;  %v1700_v52 = vsub.f32 %v1688_v30, %v1697_v50  ;;  %v1699_v56 = vsub.f32 %v1687_v32, %v1694_v51 }
0x13cc   :  { %v1705_v57 = vmul.f32 1.442695, %v1700_v52  ;;  %v1703_v63 = vmul.f32 1.442695, %v1699_v56 }
0x13ce   :  { %2763 = vpow2.f32 %v1705_v57 }
0x13cf   :  { %2765 = vpow2.f32 %v1703_v63 }
0x13d7   :  { %v2762_v0 = vpop.eup %2761 }
0x13d8   :  { %v1707_v9 = vsel %vm302_vm11, %v2762_v0, 0.0 }
0x13d9   :  { %1708 = vadd.xlane.f32.xlu0 %v1707_v9 }
0x13db   :  { %v2764_v10 = vpop.eup %2763 }
0x13dc   :  { %v2766_v16 = vpop.eup %2765  ;;  %v1713_v44 = vsel %vm309_vm15, %v2764_v10, 0.0 }
0x13dd   :  { %1714 = vadd.xlane.f32.xlu1 %v1713_v44  ;;  %v1710_v19 = vsel %vm302_vm11, %v2766_v16, 0.0 }
0x13de   :  { %1711 = vadd.xlane.f32.xlu0 %v1710_v19 }
0x13ee   :  { %1724 = vrot.lane.b32.xlu1 %v3327_v4, %s2822_s9 }
0x13f2   :  { %1792 = vrot.lane.b32.xlu1 %v3323_v53, %s2823_s10 }
0x13f4   :  { %1726 = vrot.lane.b32.xlu0 %v3323_v53, %s2822_s9 }
0x13f6   :  { %1790 = vrot.lane.b32.xlu1 %v3327_v4, %s2823_s10 }
0x13f8   :  { %1786 = vrot.lane.b32.xlu0 %v3327_v4, %s2824_s11 }
0x13fa   :  { %1788 = vrot.lane.b32.xlu1 %v3323_v53, %s2824_s11 }
0x1462   :  { %v1709_v15 = vpop.xlane.xlu0 %1708 }
0x1463   :  { %2767 = vrcp.f32 %v1709_v15 }
0x1466   :  { %v1715_v42 = vpop.xlane.xlu1 %1714 }
0x1467   :  { %v1712_v21 = vpop.xlane.xlu0 %1711  ;;  %2769 = vrcp.f32 %v1715_v42 }
0x1468   :  { %2771 = vrcp.f32 %v1712_v21 }
0x146a   :  { %v1725_v27 = vpop.permute.xlu1 %1724 }
0x146b   :  { %v1727_v22 = vpop.permute.xlu0 %1726 }
0x146c   :  { %v1736_v28 = vsel %vm350_vm3, %v1727_v22, 0  ;;  %2621 = vmatprep.subr.msk.bf16.mxu1 %vm350_vm3, %v1727_v22 }
0x146d   :  { %2542 = vmatpush3.bf16.msra.mxu1 %v1736_v28 }
0x146e   :  { %2543 = vmatprep.subr.bf16.mxu1 %v1725_v27  ;;  %v1793_v46 = vpop.permute.xlu1 %1792 }
0x146f   :  { %v1787_v25 = vpop.permute.xlu0 %1786  ;;  %v1804_v54 = vsel %vm235_vm2, %v1793_v46, 0 }
0x1470   :  { %v2768_v31 = vpop.eup %2767 }
0x1471   :  { %2544 = vmatpush3.bf16.msra.mxu1 %v1725_v27  ;;  %v1719_v41 = vmul.f32 %v2768_v31, %v2762_v0 }
0x1472   :  { %2622 = vmatprep.subr.msk.bf16.mxu1 %vm235_vm2, %v1793_v46  ;;  %v1791_v3 = vpop.permute.xlu1 %1790 }
0x1473   :  { %v1801_v30 = vsel %vm235_vm2, %v1791_v3, 0 }
0x1474   :  { %v2770_v58 = vpop.eup %2769 }
0x1475   :  { %v2772_v40 = vpop.eup %2771  ;;  %v1721_v38 = vmul.f32 %v2770_v58, %v2764_v10 }
0x1476   :  { %v1720_v43 = vmul.f32 %v2772_v40, %v2766_v16  ;;  %v1789_v32 = vpop.permute.xlu1 %1788 }
0x1477   :  { %v1723_v59 = vpack.c.bf16 %v1721_v38, %v1721_v38 }
0x1478   :  { %v1722_v45 = vpack.c.bf16 %v1720_v43, %v1719_v41 }
0x147a   :  { %2545 = vmatprep.mubr.msk.bf16.mxu1 %vm302_vm11, %v1722_v45 }
0x147b   :  { %2546 = vmatmul.mubr.msk.bf16.vlgmr.msra.gmra.mxu1 %vm302_vm11, %v1723_v59 }
0x147c   :  { %2550 = vmatpush3.bf16.xpose.msra.mxu1 %v1804_v54  ;;  %2553 = vmatprep.mubr.msk.bf16.mxu1 %vm235_vm2, %v1787_v25 }
0x147d   :  { %2623 = vmatprep.subr.msk.bf16.mxu1 %vm235_vm2, %v1791_v3 }
0x1484   :  { %2552 = vmatpush3.bf16.xpose.msra.mxu1 %v1801_v30 }
0x1485   :  { %2573 = vmatprep.subr.bf16.mxu1 %v3198_v2 }
0x148b   :  { %2554 = vmatmul.mubr.msk.bf16.vlgmr.msra.gmra.mxu1 %vm235_vm2, %v1789_v32 }
0x148c   :  { %2574 = vmatpush3.bf16.msra.mxu1 %v3198_v2 }
0x148d   :  { %2575 = vmatprep.subr.bf16.mxu1 %v3203_v5 }
0x1490   :  { %2576 = vmatpush3.bf16.msra.mxu1 %v3203_v5 }
0x153b   :  { %v2547_v33 = vpop.f32.mrf.mxu1 }
0x153d   :  { %v1772_v35 = vpop.f32.mrf.mxu1 }
0x153f   :  { %v2548_v48 = vpop.f32.mrf.mxu1 }
0x1541   :  { %v1775_v8 = vpop.f32.mrf.mxu1 }
0x1542   :  { %v2661_v49 = vpack.i.bf16 %v1775_v8, %v1772_v35 }
0x154b   :  { %v2555_v50 = vpop.f32.mrf.mxu1 }
0x154c   :  { %v1856_v52 = vmul.f32 0.35355338, %v2555_v50 }
0x154d   :  { %v1840_v51 = vpop.f32.mrf.mxu1 }
0x154e   :  { %v1854_v56 = vmul.f32 0.35355338, %v1840_v51  ;;  %v1859_v9 = vsel %vm2983_vm13, %v1856_v52, -1e+30 }
0x154f   :  { %v2556_v57 = vpop.f32.mrf.mxu1  ;;  %v1866_v16 = vsel %vm309_vm15, %v1859_v9, -inf }
0x1550   :  { %v1857_v63 = vsel %vm100_vm7, %v1854_v56, -1e+30 }
0x1551   :  { %v1843_v0 = vpop.f32.mrf.mxu1  ;;  %v1860_v2 = vsel %vm302_vm11, %v1857_v63, -inf }
0x1552   :  { %v1855_v5 = vmul.f32 0.35355338, %v1843_v0  ;;  %1861 = vmax.xlane.f32.xlu0 %v1860_v2 }
0x1554   :  { %v1858_v10 = vsel %vm2989_vm14, %v1855_v5, -1e+30 }
0x1555   :  { %v1863_v44 = vsel %vm302_vm11, %v1858_v10, -inf }
0x1556   :  { %1867 = vmax.xlane.f32.xlu0 %v1866_v16  ;;  %1864 = vmax.xlane.f32.xlu1 %v1863_v44 }
0x15db   :  { %v1862_v19 = vpop.xlane.xlu0 %1861 }
0x15dc   :  { %v1869_v14 = vsub.f32 %v1857_v63, %v1862_v19 }
0x15de   :  { %v1872_v15 = vmul.f32 1.442695, %v1869_v14 }
0x15df   :  { %v1868_v42 = vpop.xlane.xlu0 %1867  ;;  %v1865_v21 = vpop.xlane.xlu1 %1864 }
0x15e0   :  { %2773 = vpow2.f32 %v1872_v15  ;;  %v1871_v22 = vsub.f32 %v1859_v9, %v1868_v42  ;;  %v1870_v26 = vsub.f32 %v1858_v10, %v1865_v21 }
0x15e2   :  { %v1876_v27 = vmul.f32 1.442695, %v1871_v22  ;;  %v1874_v28 = vmul.f32 1.442695, %v1870_v26 }
0x15e4   :  { %2775 = vpow2.f32 %v1876_v27 }
0x15e5   :  { %2777 = vpow2.f32 %v1874_v28 }
0x15ed   :  { %v2774_v29 = vpop.eup %2773 }
0x15ee   :  { %v1878_v46 = vsel %vm302_vm11, %v2774_v29, 0.0 }
0x15ef   :  { %1879 = vadd.xlane.f32.xlu0 %v1878_v46 }
0x15f1   :  { %v2776_v31 = vpop.eup %2775 }
0x15f2   :  { %v2778_v58 = vpop.eup %2777  ;;  %v1884_v40 = vsel %vm309_vm15, %v2776_v31, 0.0 }
0x15f3   :  { %1885 = vadd.xlane.f32.xlu1 %v1884_v40  ;;  %v1881_v38 = vsel %vm302_vm11, %v2778_v58, 0.0 }
0x15f4   :  { %1882 = vadd.xlane.f32.xlu0 %v1881_v38 }
0x1604   :  { %1895 = vrot.lane.b32.xlu1 %v3327_v4, %s2825_s12 }
0x1608   :  { %2657 = vrot.lane.b32.xlu1 %v2656_v39, %s2826_s13 }
0x160a   :  { %1897 = vrot.lane.b32.xlu0 %v3323_v53, %s2825_s12 }
0x160c   :  { %1964 = vrot.lane.b32.xlu1 %v3421_v34, %s2826_s13 }
0x160e   :  { %2662 = vrot.lane.b32.xlu0 %v2661_v49, %s2827_s14 }
0x1610   :  { %1976 = vrot.lane.b32.xlu1 %v2547_v33, %s2827_s14 }
0x1678   :  { %v1880_v41 = vpop.xlane.xlu0 %1879 }
0x1679   :  { %2779 = vrcp.f32 %v1880_v41 }
0x167c   :  { %v1886_v43 = vpop.xlane.xlu1 %1885 }
0x167d   :  { %v1883_v59 = vpop.xlane.xlu0 %1882  ;;  %2781 = vrcp.f32 %v1886_v43 }
0x167e   :  { %2783 = vrcp.f32 %v1883_v59 }
0x1680   :  { %v1896_v37 = vpop.permute.xlu1 %1895 }
0x1681   :  { %v1898_v4 = vpop.permute.xlu0 %1897 }
0x1682   :  { %v1907_v36 = vsel %vm350_vm3, %v1898_v4, 0  ;;  %2624 = vmatprep.subr.msk.bf16.mxu0 %vm350_vm3, %v1898_v4 }
0x1683   :  { %2558 = vmatpush3.bf16.msra.mxu0 %v1907_v36 }
0x1684   :  { %2559 = vmatprep.subr.bf16.mxu0 %v1896_v37  ;;  %v2658_v49 = vpop.permute.xlu1 %2657 }
0x1685   :  { %v2663_v51 = vpop.permute.xlu0 %2662  ;;  %v2660_v52 = vunpack.i.h.bf16 %v2658_v49 }
0x1686   :  { %v2780_v53 = vpop.eup %2779  ;;  %v2665_v57 = vunpack.i.h.bf16 %v2663_v51  ;;  %v2664_v63 = vunpack.i.l.bf16 %v2663_v51 }
0x1687   :  { %2560 = vmatpush3.bf16.msra.mxu0 %v1896_v37  ;;  %v1890_v25 = vmul.f32 %v2780_v53, %v2774_v29 }
0x1688   :  { %2565 = vmatprep.subr.bf16.mxu0 %v3127_v55  ;;  %v1965_v50 = vpop.permute.xlu1 %1964 }
0x1689   :  { %v1995_v9 = vsel %vm235_vm2, %v3415_v18, %v1965_v50 }
0x168a   :  { %v2782_v34 = vpop.eup %2781 }
0x168b   :  { %v2784_v39 = vpop.eup %2783  ;;  %v1892_v45 = vmul.f32 %v2782_v34, %v2776_v31 }
0x168c   :  { %v1891_v54 = vmul.f32 %v2784_v39, %v2778_v58  ;;  %v1977_v56 = vpop.permute.xlu1 %1976 }
0x168d   :  { %v1894_v3 = vpack.c.bf16 %v1892_v45, %v1892_v45  ;;  %v1998_v10 = vsel %vm954_vm4, %v1995_v9, %v1977_v56 }
0x168e   :  { %v1893_v30 = vpack.c.bf16 %v1891_v54, %v1890_v25 }
0x1690   :  { %2561 = vmatprep.mubr.msk.bf16.mxu0 %vm302_vm11, %v1893_v30 }
0x1691   :  { %2562 = vmatmul.mubr.msk.bf16.vlgmr.msra.gmra.mxu0 %vm302_vm11, %v1894_v3 }
0x1692   :  { %2566 = vmatpush3.bf16.msra.mxu0 %v3127_v55  ;;  %v2659_v55 = vunpack.i.l.bf16 %v2658_v49 }
0x1693   :  { %2567 = vmatprep.subr.bf16.mxu0 %v3137_v61 }
0x1694   :  { %v1993_v0 = vsel %vm235_vm2, %v3417_v62, %v2659_v55 }
0x1695   :  { %v1996_v14 = vsel %vm954_vm4, %v1993_v0, %v2664_v63 }
0x1696   :  { %2568 = vmatpush3.bf16.msra.mxu0 %v3137_v61  ;;  %v1994_v61 = vsel %vm235_vm2, %v3419_v60, %v2660_v52 }
0x1697   :  { %2581 = vmatprep.subr.bf16.mxu0 %v3219_v11  ;;  %v1997_v15 = vsel %vm954_vm4, %v1994_v61, %v2665_v57 }
0x1751   :  { %v2563_v32 = vpop.f32.mrf.mxu0 }
0x1752   :  { %1988 = vrot.lane.b32.xlu1 %v2563_v32, %s2828_s21 }
0x1753   :  { %v1943_v33 = vpop.f32.mrf.mxu0 }
0x1755   :  { %v2564_v35 = vpop.f32.mrf.mxu0 }
0x1757   :  { %v1946_v48 = vpop.f32.mrf.mxu0 }
0x1758   :  { %v2666_v8 = vpack.i.bf16 %v1946_v48, %v1943_v33 }
0x175a   :  { %2667 = vrot.lane.b32.xlu0 %v2666_v8, %s2828_s21 }
0x17c4   :  { %v1989_v2 = vpop.permute.xlu1 %1988 }
0x17c5   :  { %v2001_v19 = vsel %vm958_vm5, %v1998_v10, %v1989_v2 }
0x17c6   :  { %v2003_v21 = vpack.c.bf16 %v2001_v19, %v2001_v19 }
0x17cc   :  { %v2668_v5 = vpop.permute.xlu0 %2667 }
0x17cd   :  { %v2670_v16 = vunpack.i.h.bf16 %v2668_v5  ;;  %v2669_v44 = vunpack.i.l.bf16 %v2668_v5 }
0x17cf   :  { %v1999_v60 = vsel %vm958_vm5, %v1996_v14, %v2669_v44  ;;  %v2000_v42 = vsel %vm958_vm5, %v1997_v15, %v2670_v16 }
0x17d0   :  { %v2002_v62 = vpack.c.bf16 %v2000_v42, %v1999_v60 }
0x17d2   :  { %2569 = vmatprep.mubr.msk.bf16.mxu0 %vm123_vm0, %v2002_v62 }
0x17d3   :  { %2570 = vmatmul.mubr.msk.bf16.vlgmr.msra.gmra.mxu0 %vm123_vm0, %v2003_v21 }
0x17d4   :  { %2582 = vmatpush3.bf16.msra.mxu0 %v3219_v11 }
0x17d5   :  { %2583 = vmatprep.subr.bf16.mxu0 %v3224_v13 }
0x17d8   :  { %2584 = vmatpush3.bf16.msra.mxu0 %v3224_v13 }
0x17d9   :  { %2585 = vmatprep.subr.bf16.mxu0 %v3235_v17 }
0x17dc   :  { %2586 = vmatpush3.bf16.msra.mxu0 %v3235_v17  ;;  %v2792_v17 = vld [vmem:[%s3567_s5] ss:$0 sm:$0xff]  ;;  %s2829_s5 = smov [#allocation2]  }
0x17dd   :  { %2587 = vmatprep.subr.bf16.mxu0 %v3245_v20  ;;  %s2220_s25 = sshll.u32 %s2829_s5, 4  ;;  %s2221_s25 = int_to_ptr.vmem [resolvable:$true] %s2220_s25 }
0x17de   :  { %s2793_s26 = scalar_lea.vmem %s2221_s25, 384  ;;  %p2798_p1 = scmp.lt.s32.totalorder %s2221_s25, %s2221_s25 }
0x17df   :  { %p2794_p0 = scmp.ne.s32.totalorder %s2221_s25, %s2793_s26  ;;  %p2799_p2 = scmp.lt.s32.totalorder %s2793_s26, %s2793_s26 }
0x17e0   :  { %2588 = vmatpush3.bf16.msra.mxu0 %v3245_v20 }
0x17e1   :  { %2589 = vmatprep.subr.bf16.mxu0 %v3255_v24  ;;  %p2800_p3 = por %p2799_p2, %p2798_p1 }
0x17e3   :  { %p2801_p4 = pnand %p2800_p3, %p2794_p0 }
0x17e4   :  { %2590 = vmatpush3.bf16.msra.mxu0 %v3255_v24 }
0x17e5   :  { %2591 = vmatprep.subr.bf16.mxu0 %v3273_v23 }
0x17e8   :  { %2592 = vmatpush3.bf16.msra.mxu0 %v3273_v23 }
0x17e9   :  { %2593 = vmatprep.subr.bf16.mxu0 %v3283_v7 }
0x17ec   :  { %2594 = vmatpush3.bf16.msra.mxu0 %v3283_v7 }
0x17ed   :  { %2595 = vmatprep.subr.bf16.mxu0 %v3293_v47 }
0x17f0   :  { %2596 = vmatpush3.bf16.msra.mxu0 %v3293_v47 }
0x1893   :  { %v2571_v11 = vpop.f32.mrf.mxu0 }
0x1894   :  { %v2053_v20 = vadd.f32 %v2792_v17, %v2571_v11 }
0x1895   :  { %v2044_v13 = vpop.f32.mrf.mxu0 }
0x1896   :  { %v2045_v24 = vadd.f32 %v2792_v17, %v2044_v13  ;;  %v2060_v26 = vadd.f32 %v2053_v20, %v3301_v6 }
0x1897   :  { %v2572_v18 = vpop.f32.mrf.mxu0 }
0x1898   :  { %v3535_v22 = vadd.f32 %v2045_v24, %v3298_v1  ;;  %v2067_v29 = vsel %vm130_vm1, %v2060_v26, 0.0 }
0x1899   :  { %v2047_v23 = vpop.f32.mrf.mxu0 }
0x189a   :  { %v2048_v7 = vadd.f32 %v2792_v17, %v2047_v23  ;;  %v2061_v27 = vsel %vm123_vm0, %v3535_v22, 0.0 }
0x189b   :  { %2062 = vadd.xlane.f32.xlu0 %v2061_v27 }
0x189c   :  { %v3541_v47 = vadd.f32 %v2048_v7, %v3306_v12 }
0x189e   :  { %v2064_v28 = vsel %vm123_vm0, %v3541_v47, 0.0 }
0x189f   :  { %2065 = vadd.xlane.f32.xlu1 %v2064_v28  ;;  %2068 = vadd.xlane.f32.xlu0 %v2067_v29 }
0x1924   :  { %v2063_v1 = vpop.xlane.xlu0 %2062 }
0x1925   :  { %v2070_v46 = vmul.f32 0.03125, %v2063_v1 }
0x1927   :  { %v2073_v31 = vsub.f32 %v3535_v22, %v2070_v46 }
0x1928   :  { %v2066_v6 = vpop.xlane.xlu1 %2065  ;;  %v2069_v58 = vpop.xlane.xlu0 %2068 }
0x1929   :  { %v2071_v40 = vmul.f32 0.03125, %v2066_v6  ;;  %v2072_v38 = vmul.f32 0.03125, %v2069_v58  ;;  %v2076_v41 = vmul.f32 %v2073_v31, %v2073_v31 }
0x192b   :  { %v2074_v43 = vsub.f32 %v3541_v47, %v2071_v40  ;;  %v2075_v12 = vsub.f32 %v2060_v26, %v2072_v38  ;;  %v2079_v59 = vsel %vm123_vm0, %v2076_v41, 0.0 }
0x192c   :  { %2080 = vadd.xlane.f32.xlu0 %v2079_v59 }
0x192d   :  { %v2077_v4 = vmul.f32 %v2074_v43, %v2074_v43  ;;  %v2078_v36 = vmul.f32 %v2075_v12, %v2075_v12 }
0x192f   :  { %v2082_v37 = vsel %vm123_vm0, %v2077_v4, 0.0  ;;  %v2085_v53 = vsel %vm130_vm1, %v2078_v36, 0.0 }
0x1930   :  { %2083 = vadd.xlane.f32.xlu0 %v2082_v37  ;;  %2086 = vadd.xlane.f32.xlu1 %v2085_v53 }
0x19b5   :  { %v2081_v34 = vpop.xlane.xlu0 %2080 }
0x19b6   :  { %v2088_v39 = vmul.f32 0.03125, %v2081_v34 }
0x19b8   :  { %v2091_v45 = vadd.f32 1e-05, %v2088_v39 }
0x19b9   :  { %v2087_v25 = vpop.xlane.xlu1 %2086  ;;  %v2084_v54 = vpop.xlane.xlu0 %2083 }
0x19ba   :  { %v2090_v3 = vmul.f32 0.03125, %v2087_v25  ;;  %v2089_v30 = vmul.f32 0.03125, %v2084_v54  ;;  %2785 = vrsqrt.f32 %v2091_v45 }
0x19bc   :  { %v2093_v32 = vadd.f32 1e-05, %v2090_v3  ;;  %v2092_v33 = vadd.f32 1e-05, %v2089_v30 }
0x19be   :  { %2787 = vrsqrt.f32 %v2093_v32 }
0x19bf   :  { %2789 = vrsqrt.f32 %v2092_v33 }
0x19c7   :  { %v2786_v35 = vpop.eup %2785 }
0x19c8   :  { %v2097_v50 = vmul.f32 %v2786_v35, %v2073_v31 }
0x19cb   :  { %v2788_v48 = vpop.eup %2787 }
0x19cc   :  { %v2790_v8 = vpop.eup %2789  ;;  %v2099_v49 = vmul.f32 %v2788_v48, %v2075_v12 }
0x19cd   :  { %v2098_v51 = vmul.f32 %v2790_v8, %v2074_v43 }
0x19ce   :  { %v2101_v52 = vpack.c.bf16 %v2099_v49, %v2099_v49 }
0x19cf   :  { %v2100_v55 = vpack.c.bf16 %v2098_v51, %v2097_v50 }
0x19d1   :  { %2577 = vmatprep.mubr.msk.bf16.mxu1 %vm123_vm0, %v2100_v55 }
0x19d2   :  { %2578 = vmatmul.mubr.msk.bf16.vlgmr.msra.gmra.mxu1 %vm123_vm0, %v2101_v52 }
0x1a92   :  { %v2579_v56 = vpop.f32.mrf.mxu1 }
0x1a93   :  { %v2158_v61 = vmax.f32 %v2579_v56, 0.0 }
0x1a94   :  { %v2142_v57 = vpop.f32.mrf.mxu1 }
0x1a95   :  { %v2156_v2 = vmax.f32 %v2142_v57, 0.0  ;;  %v2160_v10 = vpack.c.bf16 %v2158_v61, %v2158_v61 }
0x1a96   :  { %v2580_v63 = vpop.f32.mrf.mxu1 }
0x1a98   :  { %v2145_v0 = vpop.f32.mrf.mxu1 }
0x1a99   :  { %v2157_v9 = vmax.f32 %v2145_v0, 0.0 }
0x1a9b   :  { %v2159_v5 = vpack.c.bf16 %v2157_v9, %v2156_v2 }
0x1a9d   :  { %2597 = vmatprep.mubr.bf16.mxu0 %v2159_v5 }
0x1a9e   :  { %2598 = vmatmul.mubr.bf16.vlgmr.msra.gmra.mxu0 %v2160_v10 }
0x1b5e   :  { %v2599_v16 = vpop.f32.mrf.mxu0 }
0x1b5f   :  { %v2211_v44 = vadd.f32 %v2599_v16, %v2060_v26 }
0x1b60   :  { %v2195_v19 = vpop.f32.mrf.mxu0 }
0x1b61   :  { %2214 = vst.msk [vmem:[#allocation2 + $0x10] sm:$0x3] %vm130_vm1, %v2211_v44  ;;  %v2209_v14 = vadd.f32 %v2195_v19, %v3535_v22 }
0x1b62   :  { %v2600_v15 = vpop.f32.mrf.mxu0 }
0x1b63   :  { %2212 = vst.msk [vmem:[#allocation2] sm:$0xff] %vm123_vm0, %v2209_v14 }
0x1b64   :  { %v2198_v60 = vpop.f32.mrf.mxu0 }
0x1b65   :  { %v2210_v42 = vadd.f32 %v2198_v60, %v3541_v47 }
0x1b67   :  { %2213 = vst.msk [vmem:[#allocation2 + $0x8] sm:$0xff] %vm123_vm0, %v2210_v42 }
0x1b68   :  { %2804 = shalt.err (!%p2801_p4)
}
0x1b69   :  { %s2830_s27 = smov 128  }
0x1b6a   :  { %2226 = dma.vmem_to_hbm [thread:$0]  %s2221_s25, 384, %s3570_s8, [#allocation3], %s2830_s27, %s2830_s27, %s2826_s13  }
0x1b6b   :  { %2813 = dma.done.wait [#allocation3], 384  }
0x1b6c   :  { %2814 = vsyncadd [#allocation3], 4294966912 }
0x1b6d   :  { %2230 = vsyncpa [#allocation3], 1 }

</bundles_post_ra>
